<compile_context>
chip_gen: v7x
topology: tpu7x:2x2x1
jax: 0.10.0
libtpu: 0.0.40
codegen_flags: <defaults>
</compile_context>

<pallas_src>
import jax
import jax.numpy as jnp
from jax.experimental import pallas as pl
from jax.experimental.pallas import tpu as pltpu


def _hbm_copy_kernel(x_hbm, o_hbm, sem):
    # Single HBM->HBM DMA of the whole buffer; no VMEM staging, no vld/vst work.
    cp = pltpu.make_async_copy(x_hbm, o_hbm, sem)
    cp.start()
    cp.wait()


def channel_split_view(x, groups, channels_per_group, h, w):
    """Equivalent of x.view(N, groups, channels_per_group, H, W) for contiguous NCHW x."""
    n, c, hh, ww = x.shape
    assert c == groups * channels_per_group and hh == h and ww == w

    # Gridless, single DMA descriptor: operands stay in HBM (pl.ANY), the kernel
    # just moves the bytes once. At ~182 KiB this is latency-bound and as cheap
    # as a standalone Pallas op can be on v5e/v6e/v7x.
    out = pl.pallas_call(
        _hbm_copy_kernel,
        out_shape=jax.ShapeDtypeStruct(x.shape, x.dtype),
        in_specs=[pl.BlockSpec(memory_space=pl.ANY)],
        out_specs=pl.BlockSpec(memory_space=pl.ANY),
        scratch_shapes=[pltpu.SemaphoreType.DMA],
    )(x)

    # Pure-metadata reshape to the target view (matches torch .view semantics
    # on a contiguous NCHW tensor); XLA materializes no data movement here.
    return out.reshape(n, groups, channels_per_group, h, w)


if __name__ == "__main__":
    key = jax.random.PRNGKey(0)

    # Shapes implied by the module: x196 = [1, 232, 14, 14] -> view [1, 2, 116, 14, 14]
    N, C, H, W = 1, 232, 14, 14
    GROUPS = 2
    CPG = C // GROUPS  # 116

    x = jax.random.normal(key, (N, C, H, W), dtype=jnp.float32)

    out = channel_split_view(x, GROUPS, CPG, H, W)
    out = jax.block_until_ready(out)

    # Correctness check against the pure-JAX reference of torch's .view
    ref = x.reshape(N, GROUPS, CPG, H, W)
    assert out.shape == (N, GROUPS, CPG, H, W), out.shape
    assert out.dtype == jnp.float32
    assert jnp.array_equal(out, ref)

    print("KERNEL_OK")
</pallas_src>

<mosaic_0001>
module attributes {stable_mosaic.version = 11 : i64} {
  func.func @_hbm_copy_kernel(%arg0: memref<1x232x14x14xf32, #tpu.memory_space<any>>, %arg1: memref<1x232x14x14xf32, #tpu.memory_space<any>>, %arg2: memref<!tpu.dma_semaphore, #tpu.memory_space<semaphore_mem>>) attributes {dimension_semantics = [], scalar_prefetch = 0 : i64, scratch_operands = 1 : i64, tpu.core_type = #tpu.core_type<tc>} {
    tpu.enqueue_dma source(%arg0 : memref<1x232x14x14xf32, #tpu.memory_space<any>>) target(%arg1 : memref<1x232x14x14xf32, #tpu.memory_space<any>>) target_semaphore(%arg2 : memref<!tpu.dma_semaphore, #tpu.memory_space<semaphore_mem>>)
    tpu.wait_dma2 semaphore(%arg2 : memref<!tpu.dma_semaphore, #tpu.memory_space<semaphore_mem>>) src(%arg0 : memref<1x232x14x14xf32, #tpu.memory_space<any>>) dst(%arg1 : memref<1x232x14x14xf32, #tpu.memory_space<any>>)
    return
  }
}

</mosaic_0001>

<bundles_post_ra>
// kernel: tpu_custom_call.1
= control target key start
LH: loop header
LB: loop body
LE: loop exit
PB: predicated region body
PF: predicated region fallthrough
CT: control target
= control target key end

     0   :  { %s4732_s0 = inlined_call_operand.vmem [shape: f32[1,232,14,14], index: 0, kind: input, shape index: {}]   ;;  %s4733_s1 = inlined_call_operand.vmem [shape: f32[1,232,14,14], index: 1, kind: output, shape index: {}]  }
   0x1   :  { %v505_v0 = vld [vmem:[%s4732_s0] sm:$0xff]  ;;  %v507_v1 = vld [vmem:[%s4732_s0 + $0x10] sm:$0xff] }
   0x2   :  { %v509_v2 = vld [vmem:[%s4732_s0 + $0x20] sm:$0xff]  ;;  %506 = vst [vmem:[%s4733_s1] sm:$0xff] %v505_v0  ;;  %508 = vst [vmem:[%s4733_s1 + $0x10] sm:$0xff] %v507_v1  ;;  %v511_v3 = vld [vmem:[%s4732_s0 + $0x30] sm:$0xff] }
   0x3   :  { %510 = vst [vmem:[%s4733_s1 + $0x20] sm:$0xff] %v509_v2  ;;  %v513_v4 = vld [vmem:[%s4732_s0 + $0x40] sm:$0xff]  ;;  %v515_v5 = vld [vmem:[%s4732_s0 + $0x50] sm:$0xff]  ;;  %512 = vst [vmem:[%s4733_s1 + $0x30] sm:$0xff] %v511_v3 }
   0x4   :  { %514 = vst [vmem:[%s4733_s1 + $0x40] sm:$0xff] %v513_v4  ;;  %516 = vst [vmem:[%s4733_s1 + $0x50] sm:$0xff] %v515_v5  ;;  %v517_v6 = vld [vmem:[%s4732_s0 + $0x60] sm:$0xff]  ;;  %v519_v7 = vld [vmem:[%s4732_s0 + $0x70] sm:$0xff] }
   0x5   :  { %v521_v8 = vld [vmem:[%s4732_s0 + $0x80] sm:$0xff]  ;;  %518 = vst [vmem:[%s4733_s1 + $0x60] sm:$0xff] %v517_v6  ;;  %520 = vst [vmem:[%s4733_s1 + $0x70] sm:$0xff] %v519_v7  ;;  %v523_v9 = vld [vmem:[%s4732_s0 + $0x90] sm:$0xff] }
   0x6   :  { %522 = vst [vmem:[%s4733_s1 + $0x80] sm:$0xff] %v521_v8  ;;  %v525_v10 = vld [vmem:[%s4732_s0 + $0xa0] sm:$0xff]  ;;  %v527_v11 = vld [vmem:[%s4732_s0 + $0xb0] sm:$0xff]  ;;  %524 = vst [vmem:[%s4733_s1 + $0x90] sm:$0xff] %v523_v9 }
   0x7   :  { %526 = vst [vmem:[%s4733_s1 + $0xa0] sm:$0xff] %v525_v10  ;;  %528 = vst [vmem:[%s4733_s1 + $0xb0] sm:$0xff] %v527_v11  ;;  %v529_v12 = vld [vmem:[%s4732_s0 + $0xc0] sm:$0xff]  ;;  %v531_v13 = vld [vmem:[%s4732_s0 + $0xd0] sm:$0xff] }
   0x8   :  { %v533_v14 = vld [vmem:[%s4732_s0 + $0xe0] sm:$0xff]  ;;  %530 = vst [vmem:[%s4733_s1 + $0xc0] sm:$0xff] %v529_v12  ;;  %532 = vst [vmem:[%s4733_s1 + $0xd0] sm:$0xff] %v531_v13  ;;  %v535_v15 = vld [vmem:[%s4732_s0 + $0xf0] sm:$0xff] }
   0x9   :  { %534 = vst [vmem:[%s4733_s1 + $0xe0] sm:$0xff] %v533_v14  ;;  %v537_v16 = vld [vmem:[%s4732_s0 + $0x100] sm:$0xff]  ;;  %v539_v17 = vld [vmem:[%s4732_s0 + $0x110] sm:$0xff]  ;;  %536 = vst [vmem:[%s4733_s1 + $0xf0] sm:$0xff] %v535_v15 }
   0xa   :  { %538 = vst [vmem:[%s4733_s1 + $0x100] sm:$0xff] %v537_v16  ;;  %540 = vst [vmem:[%s4733_s1 + $0x110] sm:$0xff] %v539_v17  ;;  %v541_v18 = vld [vmem:[%s4732_s0 + $0x120] sm:$0xff]  ;;  %v543_v19 = vld [vmem:[%s4732_s0 + $0x130] sm:$0xff] }
   0xb   :  { %v545_v20 = vld [vmem:[%s4732_s0 + $0x140] sm:$0xff]  ;;  %542 = vst [vmem:[%s4733_s1 + $0x120] sm:$0xff] %v541_v18  ;;  %544 = vst [vmem:[%s4733_s1 + $0x130] sm:$0xff] %v543_v19  ;;  %v547_v21 = vld [vmem:[%s4732_s0 + $0x150] sm:$0xff] }
   0xc   :  { %546 = vst [vmem:[%s4733_s1 + $0x140] sm:$0xff] %v545_v20  ;;  %v549_v22 = vld [vmem:[%s4732_s0 + $0x160] sm:$0xff]  ;;  %v551_v23 = vld [vmem:[%s4732_s0 + $0x170] sm:$0xff]  ;;  %548 = vst [vmem:[%s4733_s1 + $0x150] sm:$0xff] %v547_v21 }
   0xd   :  { %550 = vst [vmem:[%s4733_s1 + $0x160] sm:$0xff] %v549_v22  ;;  %552 = vst [vmem:[%s4733_s1 + $0x170] sm:$0xff] %v551_v23  ;;  %v553_v24 = vld [vmem:[%s4732_s0 + $0x180] sm:$0xff]  ;;  %v555_v25 = vld [vmem:[%s4732_s0 + $0x190] sm:$0xff] }
   0xe   :  { %v557_v26 = vld [vmem:[%s4732_s0 + $0x1a0] sm:$0xff]  ;;  %554 = vst [vmem:[%s4733_s1 + $0x180] sm:$0xff] %v553_v24  ;;  %556 = vst [vmem:[%s4733_s1 + $0x190] sm:$0xff] %v555_v25  ;;  %v559_v27 = vld [vmem:[%s4732_s0 + $0x1b0] sm:$0xff] }
   0xf   :  { %558 = vst [vmem:[%s4733_s1 + $0x1a0] sm:$0xff] %v557_v26  ;;  %v561_v28 = vld [vmem:[%s4732_s0 + $0x1c0] sm:$0xff]  ;;  %v563_v29 = vld [vmem:[%s4732_s0 + $0x1d0] sm:$0xff]  ;;  %560 = vst [vmem:[%s4733_s1 + $0x1b0] sm:$0xff] %v559_v27 }
  0x10   :  { %562 = vst [vmem:[%s4733_s1 + $0x1c0] sm:$0xff] %v561_v28  ;;  %564 = vst [vmem:[%s4733_s1 + $0x1d0] sm:$0xff] %v563_v29  ;;  %v565_v30 = vld [vmem:[%s4732_s0 + $0x1e0] sm:$0xff]  ;;  %v567_v31 = vld [vmem:[%s4732_s0 + $0x1f0] sm:$0xff] }
  0x11   :  { %v569_v32 = vld [vmem:[%s4732_s0 + $0x200] sm:$0xff]  ;;  %566 = vst [vmem:[%s4733_s1 + $0x1e0] sm:$0xff] %v565_v30  ;;  %568 = vst [vmem:[%s4733_s1 + $0x1f0] sm:$0xff] %v567_v31  ;;  %v571_v33 = vld [vmem:[%s4732_s0 + $0x210] sm:$0xff] }
  0x12   :  { %570 = vst [vmem:[%s4733_s1 + $0x200] sm:$0xff] %v569_v32  ;;  %v573_v34 = vld [vmem:[%s4732_s0 + $0x220] sm:$0xff]  ;;  %v575_v35 = vld [vmem:[%s4732_s0 + $0x230] sm:$0xff]  ;;  %572 = vst [vmem:[%s4733_s1 + $0x210] sm:$0xff] %v571_v33 }
  0x13   :  { %574 = vst [vmem:[%s4733_s1 + $0x220] sm:$0xff] %v573_v34  ;;  %576 = vst [vmem:[%s4733_s1 + $0x230] sm:$0xff] %v575_v35  ;;  %v577_v36 = vld [vmem:[%s4732_s0 + $0x240] sm:$0xff]  ;;  %v579_v37 = vld [vmem:[%s4732_s0 + $0x250] sm:$0xff] }
  0x14   :  { %v581_v38 = vld [vmem:[%s4732_s0 + $0x260] sm:$0xff]  ;;  %578 = vst [vmem:[%s4733_s1 + $0x240] sm:$0xff] %v577_v36  ;;  %580 = vst [vmem:[%s4733_s1 + $0x250] sm:$0xff] %v579_v37  ;;  %v583_v39 = vld [vmem:[%s4732_s0 + $0x270] sm:$0xff] }
  0x15   :  { %582 = vst [vmem:[%s4733_s1 + $0x260] sm:$0xff] %v581_v38  ;;  %v585_v40 = vld [vmem:[%s4732_s0 + $0x280] sm:$0xff]  ;;  %v587_v41 = vld [vmem:[%s4732_s0 + $0x290] sm:$0xff]  ;;  %584 = vst [vmem:[%s4733_s1 + $0x270] sm:$0xff] %v583_v39 }
  0x16   :  { %586 = vst [vmem:[%s4733_s1 + $0x280] sm:$0xff] %v585_v40  ;;  %588 = vst [vmem:[%s4733_s1 + $0x290] sm:$0xff] %v587_v41  ;;  %v589_v42 = vld [vmem:[%s4732_s0 + $0x2a0] sm:$0xff]  ;;  %v591_v43 = vld [vmem:[%s4732_s0 + $0x2b0] sm:$0xff] }
  0x17   :  { %v593_v44 = vld [vmem:[%s4732_s0 + $0x2c0] sm:$0xff]  ;;  %590 = vst [vmem:[%s4733_s1 + $0x2a0] sm:$0xff] %v589_v42  ;;  %592 = vst [vmem:[%s4733_s1 + $0x2b0] sm:$0xff] %v591_v43  ;;  %v595_v45 = vld [vmem:[%s4732_s0 + $0x2d0] sm:$0xff] }
  0x18   :  { %594 = vst [vmem:[%s4733_s1 + $0x2c0] sm:$0xff] %v593_v44  ;;  %v597_v46 = vld [vmem:[%s4732_s0 + $0x2e0] sm:$0xff]  ;;  %v599_v47 = vld [vmem:[%s4732_s0 + $0x2f0] sm:$0xff]  ;;  %596 = vst [vmem:[%s4733_s1 + $0x2d0] sm:$0xff] %v595_v45 }
  0x19   :  { %598 = vst [vmem:[%s4733_s1 + $0x2e0] sm:$0xff] %v597_v46  ;;  %600 = vst [vmem:[%s4733_s1 + $0x2f0] sm:$0xff] %v599_v47  ;;  %v601_v48 = vld [vmem:[%s4732_s0 + $0x300] sm:$0xff]  ;;  %v603_v49 = vld [vmem:[%s4732_s0 + $0x310] sm:$0xff] }
  0x1a   :  { %v605_v50 = vld [vmem:[%s4732_s0 + $0x320] sm:$0xff]  ;;  %602 = vst [vmem:[%s4733_s1 + $0x300] sm:$0xff] %v601_v48  ;;  %604 = vst [vmem:[%s4733_s1 + $0x310] sm:$0xff] %v603_v49  ;;  %v607_v51 = vld [vmem:[%s4732_s0 + $0x330] sm:$0xff] }
  0x1b   :  { %606 = vst [vmem:[%s4733_s1 + $0x320] sm:$0xff] %v605_v50  ;;  %v609_v52 = vld [vmem:[%s4732_s0 + $0x340] sm:$0xff]  ;;  %v611_v53 = vld [vmem:[%s4732_s0 + $0x350] sm:$0xff]  ;;  %608 = vst [vmem:[%s4733_s1 + $0x330] sm:$0xff] %v607_v51 }
  0x1c   :  { %610 = vst [vmem:[%s4733_s1 + $0x340] sm:$0xff] %v609_v52  ;;  %612 = vst [vmem:[%s4733_s1 + $0x350] sm:$0xff] %v611_v53  ;;  %v613_v54 = vld [vmem:[%s4732_s0 + $0x360] sm:$0xff]  ;;  %v615_v55 = vld [vmem:[%s4732_s0 + $0x370] sm:$0xff] }
  0x1d   :  { %v617_v56 = vld [vmem:[%s4732_s0 + $0x380] sm:$0xff]  ;;  %614 = vst [vmem:[%s4733_s1 + $0x360] sm:$0xff] %v613_v54  ;;  %616 = vst [vmem:[%s4733_s1 + $0x370] sm:$0xff] %v615_v55  ;;  %v619_v57 = vld [vmem:[%s4732_s0 + $0x390] sm:$0xff] }
  0x1e   :  { %618 = vst [vmem:[%s4733_s1 + $0x380] sm:$0xff] %v617_v56  ;;  %v621_v58 = vld [vmem:[%s4732_s0 + $0x3a0] sm:$0xff]  ;;  %v623_v59 = vld [vmem:[%s4732_s0 + $0x3b0] sm:$0xff]  ;;  %620 = vst [vmem:[%s4733_s1 + $0x390] sm:$0xff] %v619_v57 }
  0x1f   :  { %622 = vst [vmem:[%s4733_s1 + $0x3a0] sm:$0xff] %v621_v58  ;;  %624 = vst [vmem:[%s4733_s1 + $0x3b0] sm:$0xff] %v623_v59  ;;  %v625_v60 = vld [vmem:[%s4732_s0 + $0x3c0] sm:$0xff]  ;;  %v627_v61 = vld [vmem:[%s4732_s0 + $0x3d0] sm:$0xff] }
  0x20   :  { %v629_v62 = vld [vmem:[%s4732_s0 + $0x3e0] sm:$0xff]  ;;  %626 = vst [vmem:[%s4733_s1 + $0x3c0] sm:$0xff] %v625_v60  ;;  %628 = vst [vmem:[%s4733_s1 + $0x3d0] sm:$0xff] %v627_v61  ;;  %v631_v63 = vld [vmem:[%s4732_s0 + $0x3f0] sm:$0xff] }
  0x21   :  { %630 = vst [vmem:[%s4733_s1 + $0x3e0] sm:$0xff] %v629_v62  ;;  %v633_v0 = vld [vmem:[%s4732_s0 + $0x400] sm:$0xff]  ;;  %v635_v1 = vld [vmem:[%s4732_s0 + $0x410] sm:$0xff]  ;;  %632 = vst [vmem:[%s4733_s1 + $0x3f0] sm:$0xff] %v631_v63 }
  0x22   :  { %634 = vst [vmem:[%s4733_s1 + $0x400] sm:$0xff] %v633_v0  ;;  %636 = vst [vmem:[%s4733_s1 + $0x410] sm:$0xff] %v635_v1  ;;  %v637_v2 = vld [vmem:[%s4732_s0 + $0x420] sm:$0xff]  ;;  %v639_v3 = vld [vmem:[%s4732_s0 + $0x430] sm:$0xff] }
  0x23   :  { %v641_v4 = vld [vmem:[%s4732_s0 + $0x440] sm:$0xff]  ;;  %638 = vst [vmem:[%s4733_s1 + $0x420] sm:$0xff] %v637_v2  ;;  %640 = vst [vmem:[%s4733_s1 + $0x430] sm:$0xff] %v639_v3  ;;  %v643_v5 = vld [vmem:[%s4732_s0 + $0x450] sm:$0xff] }
  0x24   :  { %642 = vst [vmem:[%s4733_s1 + $0x440] sm:$0xff] %v641_v4  ;;  %v645_v6 = vld [vmem:[%s4732_s0 + $0x460] sm:$0xff]  ;;  %v647_v7 = vld [vmem:[%s4732_s0 + $0x470] sm:$0xff]  ;;  %644 = vst [vmem:[%s4733_s1 + $0x450] sm:$0xff] %v643_v5 }
  0x25   :  { %646 = vst [vmem:[%s4733_s1 + $0x460] sm:$0xff] %v645_v6  ;;  %648 = vst [vmem:[%s4733_s1 + $0x470] sm:$0xff] %v647_v7  ;;  %v649_v8 = vld [vmem:[%s4732_s0 + $0x480] sm:$0xff]  ;;  %v651_v9 = vld [vmem:[%s4732_s0 + $0x490] sm:$0xff] }
  0x26   :  { %v653_v10 = vld [vmem:[%s4732_s0 + $0x4a0] sm:$0xff]  ;;  %650 = vst [vmem:[%s4733_s1 + $0x480] sm:$0xff] %v649_v8  ;;  %652 = vst [vmem:[%s4733_s1 + $0x490] sm:$0xff] %v651_v9  ;;  %v655_v11 = vld [vmem:[%s4732_s0 + $0x4b0] sm:$0xff] }
  0x27   :  { %654 = vst [vmem:[%s4733_s1 + $0x4a0] sm:$0xff] %v653_v10  ;;  %v657_v12 = vld [vmem:[%s4732_s0 + $0x4c0] sm:$0xff]  ;;  %v659_v13 = vld [vmem:[%s4732_s0 + $0x4d0] sm:$0xff]  ;;  %656 = vst [vmem:[%s4733_s1 + $0x4b0] sm:$0xff] %v655_v11 }
  0x28   :  { %658 = vst [vmem:[%s4733_s1 + $0x4c0] sm:$0xff] %v657_v12  ;;  %660 = vst [vmem:[%s4733_s1 + $0x4d0] sm:$0xff] %v659_v13  ;;  %v661_v14 = vld [vmem:[%s4732_s0 + $0x4e0] sm:$0xff]  ;;  %v663_v15 = vld [vmem:[%s4732_s0 + $0x4f0] sm:$0xff] }
  0x29   :  { %v665_v16 = vld [vmem:[%s4732_s0 + $0x500] sm:$0xff]  ;;  %662 = vst [vmem:[%s4733_s1 + $0x4e0] sm:$0xff] %v661_v14  ;;  %664 = vst [vmem:[%s4733_s1 + $0x4f0] sm:$0xff] %v663_v15  ;;  %v667_v17 = vld [vmem:[%s4732_s0 + $0x510] sm:$0xff] }
  0x2a   :  { %666 = vst [vmem:[%s4733_s1 + $0x500] sm:$0xff] %v665_v16  ;;  %v669_v18 = vld [vmem:[%s4732_s0 + $0x520] sm:$0xff]  ;;  %v671_v19 = vld [vmem:[%s4732_s0 + $0x530] sm:$0xff]  ;;  %668 = vst [vmem:[%s4733_s1 + $0x510] sm:$0xff] %v667_v17 }
  0x2b   :  { %670 = vst [vmem:[%s4733_s1 + $0x520] sm:$0xff] %v669_v18  ;;  %672 = vst [vmem:[%s4733_s1 + $0x530] sm:$0xff] %v671_v19  ;;  %v673_v20 = vld [vmem:[%s4732_s0 + $0x540] sm:$0xff]  ;;  %v675_v21 = vld [vmem:[%s4732_s0 + $0x550] sm:$0xff] }
  0x2c   :  { %v677_v22 = vld [vmem:[%s4732_s0 + $0x560] sm:$0xff]  ;;  %674 = vst [vmem:[%s4733_s1 + $0x540] sm:$0xff] %v673_v20  ;;  %676 = vst [vmem:[%s4733_s1 + $0x550] sm:$0xff] %v675_v21  ;;  %v679_v23 = vld [vmem:[%s4732_s0 + $0x570] sm:$0xff] }
  0x2d   :  { %678 = vst [vmem:[%s4733_s1 + $0x560] sm:$0xff] %v677_v22  ;;  %v681_v24 = vld [vmem:[%s4732_s0 + $0x580] sm:$0xff]  ;;  %v683_v25 = vld [vmem:[%s4732_s0 + $0x590] sm:$0xff]  ;;  %680 = vst [vmem:[%s4733_s1 + $0x570] sm:$0xff] %v679_v23 }
  0x2e   :  { %682 = vst [vmem:[%s4733_s1 + $0x580] sm:$0xff] %v681_v24  ;;  %684 = vst [vmem:[%s4733_s1 + $0x590] sm:$0xff] %v683_v25  ;;  %v685_v26 = vld [vmem:[%s4732_s0 + $0x5a0] sm:$0xff]  ;;  %v687_v27 = vld [vmem:[%s4732_s0 + $0x5b0] sm:$0xff] }
  0x2f   :  { %v689_v28 = vld [vmem:[%s4732_s0 + $0x5c0] sm:$0xff]  ;;  %686 = vst [vmem:[%s4733_s1 + $0x5a0] sm:$0xff] %v685_v26  ;;  %688 = vst [vmem:[%s4733_s1 + $0x5b0] sm:$0xff] %v687_v27  ;;  %v691_v29 = vld [vmem:[%s4732_s0 + $0x5d0] sm:$0xff] }
  0x30   :  { %690 = vst [vmem:[%s4733_s1 + $0x5c0] sm:$0xff] %v689_v28  ;;  %v693_v30 = vld [vmem:[%s4732_s0 + $0x5e0] sm:$0xff]  ;;  %v695_v31 = vld [vmem:[%s4732_s0 + $0x5f0] sm:$0xff]  ;;  %692 = vst [vmem:[%s4733_s1 + $0x5d0] sm:$0xff] %v691_v29 }
  0x31   :  { %694 = vst [vmem:[%s4733_s1 + $0x5e0] sm:$0xff] %v693_v30  ;;  %696 = vst [vmem:[%s4733_s1 + $0x5f0] sm:$0xff] %v695_v31  ;;  %v697_v32 = vld [vmem:[%s4732_s0 + $0x600] sm:$0xff]  ;;  %v699_v33 = vld [vmem:[%s4732_s0 + $0x610] sm:$0xff] }
  0x32   :  { %v701_v34 = vld [vmem:[%s4732_s0 + $0x620] sm:$0xff]  ;;  %698 = vst [vmem:[%s4733_s1 + $0x600] sm:$0xff] %v697_v32  ;;  %700 = vst [vmem:[%s4733_s1 + $0x610] sm:$0xff] %v699_v33  ;;  %v703_v35 = vld [vmem:[%s4732_s0 + $0x630] sm:$0xff] }
  0x33   :  { %702 = vst [vmem:[%s4733_s1 + $0x620] sm:$0xff] %v701_v34  ;;  %v705_v36 = vld [vmem:[%s4732_s0 + $0x640] sm:$0xff]  ;;  %v707_v37 = vld [vmem:[%s4732_s0 + $0x650] sm:$0xff]  ;;  %704 = vst [vmem:[%s4733_s1 + $0x630] sm:$0xff] %v703_v35 }
  0x34   :  { %706 = vst [vmem:[%s4733_s1 + $0x640] sm:$0xff] %v705_v36  ;;  %708 = vst [vmem:[%s4733_s1 + $0x650] sm:$0xff] %v707_v37  ;;  %v709_v38 = vld [vmem:[%s4732_s0 + $0x660] sm:$0xff]  ;;  %v711_v39 = vld [vmem:[%s4732_s0 + $0x670] sm:$0xff] }
  0x35   :  { %v713_v40 = vld [vmem:[%s4732_s0 + $0x680] sm:$0xff]  ;;  %710 = vst [vmem:[%s4733_s1 + $0x660] sm:$0xff] %v709_v38  ;;  %712 = vst [vmem:[%s4733_s1 + $0x670] sm:$0xff] %v711_v39  ;;  %v715_v41 = vld [vmem:[%s4732_s0 + $0x690] sm:$0xff] }
  0x36   :  { %714 = vst [vmem:[%s4733_s1 + $0x680] sm:$0xff] %v713_v40  ;;  %v717_v42 = vld [vmem:[%s4732_s0 + $0x6a0] sm:$0xff]  ;;  %v719_v43 = vld [vmem:[%s4732_s0 + $0x6b0] sm:$0xff]  ;;  %716 = vst [vmem:[%s4733_s1 + $0x690] sm:$0xff] %v715_v41 }
  0x37   :  { %718 = vst [vmem:[%s4733_s1 + $0x6a0] sm:$0xff] %v717_v42  ;;  %720 = vst [vmem:[%s4733_s1 + $0x6b0] sm:$0xff] %v719_v43  ;;  %v721_v44 = vld [vmem:[%s4732_s0 + $0x6c0] sm:$0xff]  ;;  %v723_v45 = vld [vmem:[%s4732_s0 + $0x6d0] sm:$0xff] }
  0x38   :  { %v725_v46 = vld [vmem:[%s4732_s0 + $0x6e0] sm:$0xff]  ;;  %722 = vst [vmem:[%s4733_s1 + $0x6c0] sm:$0xff] %v721_v44  ;;  %724 = vst [vmem:[%s4733_s1 + $0x6d0] sm:$0xff] %v723_v45  ;;  %v727_v47 = vld [vmem:[%s4732_s0 + $0x6f0] sm:$0xff] }
  0x39   :  { %726 = vst [vmem:[%s4733_s1 + $0x6e0] sm:$0xff] %v725_v46  ;;  %v729_v48 = vld [vmem:[%s4732_s0 + $0x700] sm:$0xff]  ;;  %v731_v49 = vld [vmem:[%s4732_s0 + $0x710] sm:$0xff]  ;;  %728 = vst [vmem:[%s4733_s1 + $0x6f0] sm:$0xff] %v727_v47 }
  0x3a   :  { %730 = vst [vmem:[%s4733_s1 + $0x700] sm:$0xff] %v729_v48  ;;  %732 = vst [vmem:[%s4733_s1 + $0x710] sm:$0xff] %v731_v49  ;;  %v733_v50 = vld [vmem:[%s4732_s0 + $0x720] sm:$0xff]  ;;  %v735_v51 = vld [vmem:[%s4732_s0 + $0x730] sm:$0xff] }
  0x3b   :  { %v737_v52 = vld [vmem:[%s4732_s0 + $0x740] sm:$0xff]  ;;  %734 = vst [vmem:[%s4733_s1 + $0x720] sm:$0xff] %v733_v50  ;;  %736 = vst [vmem:[%s4733_s1 + $0x730] sm:$0xff] %v735_v51  ;;  %v739_v53 = vld [vmem:[%s4732_s0 + $0x750] sm:$0xff] }
  0x3c   :  { %738 = vst [vmem:[%s4733_s1 + $0x740] sm:$0xff] %v737_v52  ;;  %v741_v54 = vld [vmem:[%s4732_s0 + $0x760] sm:$0xff]  ;;  %v743_v55 = vld [vmem:[%s4732_s0 + $0x770] sm:$0xff]  ;;  %740 = vst [vmem:[%s4733_s1 + $0x750] sm:$0xff] %v739_v53 }
  0x3d   :  { %742 = vst [vmem:[%s4733_s1 + $0x760] sm:$0xff] %v741_v54  ;;  %744 = vst [vmem:[%s4733_s1 + $0x770] sm:$0xff] %v743_v55  ;;  %v745_v56 = vld [vmem:[%s4732_s0 + $0x780] sm:$0xff]  ;;  %v747_v57 = vld [vmem:[%s4732_s0 + $0x790] sm:$0xff] }
  0x3e   :  { %v749_v58 = vld [vmem:[%s4732_s0 + $0x7a0] sm:$0xff]  ;;  %746 = vst [vmem:[%s4733_s1 + $0x780] sm:$0xff] %v745_v56  ;;  %748 = vst [vmem:[%s4733_s1 + $0x790] sm:$0xff] %v747_v57  ;;  %v751_v59 = vld [vmem:[%s4732_s0 + $0x7b0] sm:$0xff] }
  0x3f   :  { %750 = vst [vmem:[%s4733_s1 + $0x7a0] sm:$0xff] %v749_v58  ;;  %v753_v60 = vld [vmem:[%s4732_s0 + $0x7c0] sm:$0xff]  ;;  %v755_v61 = vld [vmem:[%s4732_s0 + $0x7d0] sm:$0xff]  ;;  %752 = vst [vmem:[%s4733_s1 + $0x7b0] sm:$0xff] %v751_v59 }
  0x40   :  { %754 = vst [vmem:[%s4733_s1 + $0x7c0] sm:$0xff] %v753_v60  ;;  %756 = vst [vmem:[%s4733_s1 + $0x7d0] sm:$0xff] %v755_v61  ;;  %v757_v62 = vld [vmem:[%s4732_s0 + $0x7e0] sm:$0xff]  ;;  %v759_v63 = vld [vmem:[%s4732_s0 + $0x7f0] sm:$0xff] }
  0x41   :  { %v761_v0 = vld [vmem:[%s4732_s0 + $0x800] sm:$0xff]  ;;  %758 = vst [vmem:[%s4733_s1 + $0x7e0] sm:$0xff] %v757_v62  ;;  %760 = vst [vmem:[%s4733_s1 + $0x7f0] sm:$0xff] %v759_v63  ;;  %v763_v1 = vld [vmem:[%s4732_s0 + $0x810] sm:$0xff] }
  0x42   :  { %762 = vst [vmem:[%s4733_s1 + $0x800] sm:$0xff] %v761_v0  ;;  %v765_v2 = vld [vmem:[%s4732_s0 + $0x820] sm:$0xff]  ;;  %v767_v3 = vld [vmem:[%s4732_s0 + $0x830] sm:$0xff]  ;;  %764 = vst [vmem:[%s4733_s1 + $0x810] sm:$0xff] %v763_v1 }
  0x43   :  { %766 = vst [vmem:[%s4733_s1 + $0x820] sm:$0xff] %v765_v2  ;;  %768 = vst [vmem:[%s4733_s1 + $0x830] sm:$0xff] %v767_v3  ;;  %v769_v4 = vld [vmem:[%s4732_s0 + $0x840] sm:$0xff]  ;;  %v771_v5 = vld [vmem:[%s4732_s0 + $0x850] sm:$0xff] }
  0x44   :  { %v773_v6 = vld [vmem:[%s4732_s0 + $0x860] sm:$0xff]  ;;  %770 = vst [vmem:[%s4733_s1 + $0x840] sm:$0xff] %v769_v4  ;;  %772 = vst [vmem:[%s4733_s1 + $0x850] sm:$0xff] %v771_v5  ;;  %v775_v7 = vld [vmem:[%s4732_s0 + $0x870] sm:$0xff] }
  0x45   :  { %774 = vst [vmem:[%s4733_s1 + $0x860] sm:$0xff] %v773_v6  ;;  %v777_v8 = vld [vmem:[%s4732_s0 + $0x880] sm:$0xff]  ;;  %v779_v9 = vld [vmem:[%s4732_s0 + $0x890] sm:$0xff]  ;;  %776 = vst [vmem:[%s4733_s1 + $0x870] sm:$0xff] %v775_v7 }
  0x46   :  { %778 = vst [vmem:[%s4733_s1 + $0x880] sm:$0xff] %v777_v8  ;;  %780 = vst [vmem:[%s4733_s1 + $0x890] sm:$0xff] %v779_v9  ;;  %v781_v10 = vld [vmem:[%s4732_s0 + $0x8a0] sm:$0xff]  ;;  %v783_v11 = vld [vmem:[%s4732_s0 + $0x8b0] sm:$0xff] }
  0x47   :  { %v785_v12 = vld [vmem:[%s4732_s0 + $0x8c0] sm:$0xff]  ;;  %782 = vst [vmem:[%s4733_s1 + $0x8a0] sm:$0xff] %v781_v10  ;;  %784 = vst [vmem:[%s4733_s1 + $0x8b0] sm:$0xff] %v783_v11  ;;  %v787_v13 = vld [vmem:[%s4732_s0 + $0x8d0] sm:$0xff] }
  0x48   :  { %786 = vst [vmem:[%s4733_s1 + $0x8c0] sm:$0xff] %v785_v12  ;;  %v789_v14 = vld [vmem:[%s4732_s0 + $0x8e0] sm:$0xff]  ;;  %v791_v15 = vld [vmem:[%s4732_s0 + $0x8f0] sm:$0xff]  ;;  %788 = vst [vmem:[%s4733_s1 + $0x8d0] sm:$0xff] %v787_v13 }
  0x49   :  { %790 = vst [vmem:[%s4733_s1 + $0x8e0] sm:$0xff] %v789_v14  ;;  %792 = vst [vmem:[%s4733_s1 + $0x8f0] sm:$0xff] %v791_v15  ;;  %v793_v16 = vld [vmem:[%s4732_s0 + $0x900] sm:$0xff]  ;;  %v795_v17 = vld [vmem:[%s4732_s0 + $0x910] sm:$0xff] }
  0x4a   :  { %v797_v18 = vld [vmem:[%s4732_s0 + $0x920] sm:$0xff]  ;;  %794 = vst [vmem:[%s4733_s1 + $0x900] sm:$0xff] %v793_v16  ;;  %796 = vst [vmem:[%s4733_s1 + $0x910] sm:$0xff] %v795_v17  ;;  %v799_v19 = vld [vmem:[%s4732_s0 + $0x930] sm:$0xff] }
  0x4b   :  { %798 = vst [vmem:[%s4733_s1 + $0x920] sm:$0xff] %v797_v18  ;;  %v801_v20 = vld [vmem:[%s4732_s0 + $0x940] sm:$0xff]  ;;  %v803_v21 = vld [vmem:[%s4732_s0 + $0x950] sm:$0xff]  ;;  %800 = vst [vmem:[%s4733_s1 + $0x930] sm:$0xff] %v799_v19 }
  0x4c   :  { %802 = vst [vmem:[%s4733_s1 + $0x940] sm:$0xff] %v801_v20  ;;  %804 = vst [vmem:[%s4733_s1 + $0x950] sm:$0xff] %v803_v21  ;;  %v805_v22 = vld [vmem:[%s4732_s0 + $0x960] sm:$0xff]  ;;  %v807_v23 = vld [vmem:[%s4732_s0 + $0x970] sm:$0xff] }
  0x4d   :  { %v809_v24 = vld [vmem:[%s4732_s0 + $0x980] sm:$0xff]  ;;  %806 = vst [vmem:[%s4733_s1 + $0x960] sm:$0xff] %v805_v22  ;;  %808 = vst [vmem:[%s4733_s1 + $0x970] sm:$0xff] %v807_v23  ;;  %v811_v25 = vld [vmem:[%s4732_s0 + $0x990] sm:$0xff] }
  0x4e   :  { %810 = vst [vmem:[%s4733_s1 + $0x980] sm:$0xff] %v809_v24  ;;  %v813_v26 = vld [vmem:[%s4732_s0 + $0x9a0] sm:$0xff]  ;;  %v815_v27 = vld [vmem:[%s4732_s0 + $0x9b0] sm:$0xff]  ;;  %812 = vst [vmem:[%s4733_s1 + $0x990] sm:$0xff] %v811_v25 }
  0x4f   :  { %814 = vst [vmem:[%s4733_s1 + $0x9a0] sm:$0xff] %v813_v26  ;;  %816 = vst [vmem:[%s4733_s1 + $0x9b0] sm:$0xff] %v815_v27  ;;  %v817_v28 = vld [vmem:[%s4732_s0 + $0x9c0] sm:$0xff]  ;;  %v819_v29 = vld [vmem:[%s4732_s0 + $0x9d0] sm:$0xff] }
  0x50   :  { %v821_v30 = vld [vmem:[%s4732_s0 + $0x9e0] sm:$0xff]  ;;  %818 = vst [vmem:[%s4733_s1 + $0x9c0] sm:$0xff] %v817_v28  ;;  %820 = vst [vmem:[%s4733_s1 + $0x9d0] sm:$0xff] %v819_v29  ;;  %v823_v31 = vld [vmem:[%s4732_s0 + $0x9f0] sm:$0xff] }
  0x51   :  { %822 = vst [vmem:[%s4733_s1 + $0x9e0] sm:$0xff] %v821_v30  ;;  %v825_v32 = vld [vmem:[%s4732_s0 + $0xa00] sm:$0xff]  ;;  %v827_v33 = vld [vmem:[%s4732_s0 + $0xa10] sm:$0xff]  ;;  %824 = vst [vmem:[%s4733_s1 + $0x9f0] sm:$0xff] %v823_v31 }
  0x52   :  { %826 = vst [vmem:[%s4733_s1 + $0xa00] sm:$0xff] %v825_v32  ;;  %828 = vst [vmem:[%s4733_s1 + $0xa10] sm:$0xff] %v827_v33  ;;  %v829_v34 = vld [vmem:[%s4732_s0 + $0xa20] sm:$0xff]  ;;  %v831_v35 = vld [vmem:[%s4732_s0 + $0xa30] sm:$0xff] }
  0x53   :  { %v833_v36 = vld [vmem:[%s4732_s0 + $0xa40] sm:$0xff]  ;;  %830 = vst [vmem:[%s4733_s1 + $0xa20] sm:$0xff] %v829_v34  ;;  %832 = vst [vmem:[%s4733_s1 + $0xa30] sm:$0xff] %v831_v35  ;;  %v835_v37 = vld [vmem:[%s4732_s0 + $0xa50] sm:$0xff] }
  0x54   :  { %834 = vst [vmem:[%s4733_s1 + $0xa40] sm:$0xff] %v833_v36  ;;  %v837_v38 = vld [vmem:[%s4732_s0 + $0xa60] sm:$0xff]  ;;  %v839_v39 = vld [vmem:[%s4732_s0 + $0xa70] sm:$0xff]  ;;  %836 = vst [vmem:[%s4733_s1 + $0xa50] sm:$0xff] %v835_v37 }
  0x55   :  { %838 = vst [vmem:[%s4733_s1 + $0xa60] sm:$0xff] %v837_v38  ;;  %840 = vst [vmem:[%s4733_s1 + $0xa70] sm:$0xff] %v839_v39  ;;  %v841_v40 = vld [vmem:[%s4732_s0 + $0xa80] sm:$0xff]  ;;  %v843_v41 = vld [vmem:[%s4732_s0 + $0xa90] sm:$0xff] }
  0x56   :  { %v845_v42 = vld [vmem:[%s4732_s0 + $0xaa0] sm:$0xff]  ;;  %842 = vst [vmem:[%s4733_s1 + $0xa80] sm:$0xff] %v841_v40  ;;  %844 = vst [vmem:[%s4733_s1 + $0xa90] sm:$0xff] %v843_v41  ;;  %v847_v43 = vld [vmem:[%s4732_s0 + $0xab0] sm:$0xff] }
  0x57   :  { %846 = vst [vmem:[%s4733_s1 + $0xaa0] sm:$0xff] %v845_v42  ;;  %v849_v44 = vld [vmem:[%s4732_s0 + $0xac0] sm:$0xff]  ;;  %v851_v45 = vld [vmem:[%s4732_s0 + $0xad0] sm:$0xff]  ;;  %848 = vst [vmem:[%s4733_s1 + $0xab0] sm:$0xff] %v847_v43 }
  0x58   :  { %850 = vst [vmem:[%s4733_s1 + $0xac0] sm:$0xff] %v849_v44  ;;  %852 = vst [vmem:[%s4733_s1 + $0xad0] sm:$0xff] %v851_v45  ;;  %v853_v46 = vld [vmem:[%s4732_s0 + $0xae0] sm:$0xff]  ;;  %v855_v47 = vld [vmem:[%s4732_s0 + $0xaf0] sm:$0xff] }
  0x59   :  { %v857_v48 = vld [vmem:[%s4732_s0 + $0xb00] sm:$0xff]  ;;  %854 = vst [vmem:[%s4733_s1 + $0xae0] sm:$0xff] %v853_v46  ;;  %856 = vst [vmem:[%s4733_s1 + $0xaf0] sm:$0xff] %v855_v47  ;;  %v859_v49 = vld [vmem:[%s4732_s0 + $0xb10] sm:$0xff] }
  0x5a   :  { %858 = vst [vmem:[%s4733_s1 + $0xb00] sm:$0xff] %v857_v48  ;;  %v861_v50 = vld [vmem:[%s4732_s0 + $0xb20] sm:$0xff]  ;;  %v863_v51 = vld [vmem:[%s4732_s0 + $0xb30] sm:$0xff]  ;;  %860 = vst [vmem:[%s4733_s1 + $0xb10] sm:$0xff] %v859_v49 }
  0x5b   :  { %862 = vst [vmem:[%s4733_s1 + $0xb20] sm:$0xff] %v861_v50  ;;  %864 = vst [vmem:[%s4733_s1 + $0xb30] sm:$0xff] %v863_v51  ;;  %v865_v52 = vld [vmem:[%s4732_s0 + $0xb40] sm:$0xff]  ;;  %v867_v53 = vld [vmem:[%s4732_s0 + $0xb50] sm:$0xff] }
  0x5c   :  { %v869_v54 = vld [vmem:[%s4732_s0 + $0xb60] sm:$0xff]  ;;  %866 = vst [vmem:[%s4733_s1 + $0xb40] sm:$0xff] %v865_v52  ;;  %868 = vst [vmem:[%s4733_s1 + $0xb50] sm:$0xff] %v867_v53  ;;  %v871_v55 = vld [vmem:[%s4732_s0 + $0xb70] sm:$0xff] }
  0x5d   :  { %870 = vst [vmem:[%s4733_s1 + $0xb60] sm:$0xff] %v869_v54  ;;  %v873_v56 = vld [vmem:[%s4732_s0 + $0xb80] sm:$0xff]  ;;  %v875_v57 = vld [vmem:[%s4732_s0 + $0xb90] sm:$0xff]  ;;  %872 = vst [vmem:[%s4733_s1 + $0xb70] sm:$0xff] %v871_v55 }
  0x5e   :  { %874 = vst [vmem:[%s4733_s1 + $0xb80] sm:$0xff] %v873_v56  ;;  %876 = vst [vmem:[%s4733_s1 + $0xb90] sm:$0xff] %v875_v57  ;;  %v877_v58 = vld [vmem:[%s4732_s0 + $0xba0] sm:$0xff]  ;;  %v879_v59 = vld [vmem:[%s4732_s0 + $0xbb0] sm:$0xff] }
  0x5f   :  { %v881_v60 = vld [vmem:[%s4732_s0 + $0xbc0] sm:$0xff]  ;;  %878 = vst [vmem:[%s4733_s1 + $0xba0] sm:$0xff] %v877_v58  ;;  %880 = vst [vmem:[%s4733_s1 + $0xbb0] sm:$0xff] %v879_v59  ;;  %v883_v61 = vld [vmem:[%s4732_s0 + $0xbd0] sm:$0xff] }
  0x60   :  { %882 = vst [vmem:[%s4733_s1 + $0xbc0] sm:$0xff] %v881_v60  ;;  %v885_v62 = vld [vmem:[%s4732_s0 + $0xbe0] sm:$0xff]  ;;  %v887_v63 = vld [vmem:[%s4732_s0 + $0xbf0] sm:$0xff]  ;;  %884 = vst [vmem:[%s4733_s1 + $0xbd0] sm:$0xff] %v883_v61 }
  0x61   :  { %886 = vst [vmem:[%s4733_s1 + $0xbe0] sm:$0xff] %v885_v62  ;;  %888 = vst [vmem:[%s4733_s1 + $0xbf0] sm:$0xff] %v887_v63  ;;  %v889_v0 = vld [vmem:[%s4732_s0 + $0xc00] sm:$0xff]  ;;  %v891_v1 = vld [vmem:[%s4732_s0 + $0xc10] sm:$0xff] }
  0x62   :  { %v893_v2 = vld [vmem:[%s4732_s0 + $0xc20] sm:$0xff]  ;;  %890 = vst [vmem:[%s4733_s1 + $0xc00] sm:$0xff] %v889_v0  ;;  %892 = vst [vmem:[%s4733_s1 + $0xc10] sm:$0xff] %v891_v1  ;;  %v895_v3 = vld [vmem:[%s4732_s0 + $0xc30] sm:$0xff] }
  0x63   :  { %894 = vst [vmem:[%s4733_s1 + $0xc20] sm:$0xff] %v893_v2  ;;  %v897_v4 = vld [vmem:[%s4732_s0 + $0xc40] sm:$0xff]  ;;  %v899_v5 = vld [vmem:[%s4732_s0 + $0xc50] sm:$0xff]  ;;  %896 = vst [vmem:[%s4733_s1 + $0xc30] sm:$0xff] %v895_v3 }
  0x64   :  { %898 = vst [vmem:[%s4733_s1 + $0xc40] sm:$0xff] %v897_v4  ;;  %900 = vst [vmem:[%s4733_s1 + $0xc50] sm:$0xff] %v899_v5  ;;  %v901_v6 = vld [vmem:[%s4732_s0 + $0xc60] sm:$0xff]  ;;  %v903_v7 = vld [vmem:[%s4732_s0 + $0xc70] sm:$0xff] }
  0x65   :  { %v905_v8 = vld [vmem:[%s4732_s0 + $0xc80] sm:$0xff]  ;;  %902 = vst [vmem:[%s4733_s1 + $0xc60] sm:$0xff] %v901_v6  ;;  %904 = vst [vmem:[%s4733_s1 + $0xc70] sm:$0xff] %v903_v7  ;;  %v907_v9 = vld [vmem:[%s4732_s0 + $0xc90] sm:$0xff] }
  0x66   :  { %906 = vst [vmem:[%s4733_s1 + $0xc80] sm:$0xff] %v905_v8  ;;  %v909_v10 = vld [vmem:[%s4732_s0 + $0xca0] sm:$0xff]  ;;  %v911_v11 = vld [vmem:[%s4732_s0 + $0xcb0] sm:$0xff]  ;;  %908 = vst [vmem:[%s4733_s1 + $0xc90] sm:$0xff] %v907_v9 }
  0x67   :  { %910 = vst [vmem:[%s4733_s1 + $0xca0] sm:$0xff] %v909_v10  ;;  %912 = vst [vmem:[%s4733_s1 + $0xcb0] sm:$0xff] %v911_v11  ;;  %v913_v12 = vld [vmem:[%s4732_s0 + $0xcc0] sm:$0xff]  ;;  %v915_v13 = vld [vmem:[%s4732_s0 + $0xcd0] sm:$0xff] }
  0x68   :  { %v917_v14 = vld [vmem:[%s4732_s0 + $0xce0] sm:$0xff]  ;;  %914 = vst [vmem:[%s4733_s1 + $0xcc0] sm:$0xff] %v913_v12  ;;  %916 = vst [vmem:[%s4733_s1 + $0xcd0] sm:$0xff] %v915_v13  ;;  %v919_v15 = vld [vmem:[%s4732_s0 + $0xcf0] sm:$0xff] }
  0x69   :  { %918 = vst [vmem:[%s4733_s1 + $0xce0] sm:$0xff] %v917_v14  ;;  %v921_v16 = vld [vmem:[%s4732_s0 + $0xd00] sm:$0xff]  ;;  %v923_v17 = vld [vmem:[%s4732_s0 + $0xd10] sm:$0xff]  ;;  %920 = vst [vmem:[%s4733_s1 + $0xcf0] sm:$0xff] %v919_v15 }
  0x6a   :  { %922 = vst [vmem:[%s4733_s1 + $0xd00] sm:$0xff] %v921_v16  ;;  %924 = vst [vmem:[%s4733_s1 + $0xd10] sm:$0xff] %v923_v17  ;;  %v925_v18 = vld [vmem:[%s4732_s0 + $0xd20] sm:$0xff]  ;;  %v927_v19 = vld [vmem:[%s4732_s0 + $0xd30] sm:$0xff] }
  0x6b   :  { %v929_v20 = vld [vmem:[%s4732_s0 + $0xd40] sm:$0xff]  ;;  %926 = vst [vmem:[%s4733_s1 + $0xd20] sm:$0xff] %v925_v18  ;;  %928 = vst [vmem:[%s4733_s1 + $0xd30] sm:$0xff] %v927_v19  ;;  %v931_v21 = vld [vmem:[%s4732_s0 + $0xd50] sm:$0xff] }
  0x6c   :  { %930 = vst [vmem:[%s4733_s1 + $0xd40] sm:$0xff] %v929_v20  ;;  %v933_v22 = vld [vmem:[%s4732_s0 + $0xd60] sm:$0xff]  ;;  %v935_v23 = vld [vmem:[%s4732_s0 + $0xd70] sm:$0xff]  ;;  %932 = vst [vmem:[%s4733_s1 + $0xd50] sm:$0xff] %v931_v21 }
  0x6d   :  { %934 = vst [vmem:[%s4733_s1 + $0xd60] sm:$0xff] %v933_v22  ;;  %936 = vst [vmem:[%s4733_s1 + $0xd70] sm:$0xff] %v935_v23  ;;  %v937_v24 = vld [vmem:[%s4732_s0 + $0xd80] sm:$0xff]  ;;  %v939_v25 = vld [vmem:[%s4732_s0 + $0xd90] sm:$0xff] }
  0x6e   :  { %v941_v26 = vld [vmem:[%s4732_s0 + $0xda0] sm:$0xff]  ;;  %938 = vst [vmem:[%s4733_s1 + $0xd80] sm:$0xff] %v937_v24  ;;  %940 = vst [vmem:[%s4733_s1 + $0xd90] sm:$0xff] %v939_v25  ;;  %v943_v27 = vld [vmem:[%s4732_s0 + $0xdb0] sm:$0xff] }
  0x6f   :  { %942 = vst [vmem:[%s4733_s1 + $0xda0] sm:$0xff] %v941_v26  ;;  %v945_v28 = vld [vmem:[%s4732_s0 + $0xdc0] sm:$0xff]  ;;  %v947_v29 = vld [vmem:[%s4732_s0 + $0xdd0] sm:$0xff]  ;;  %944 = vst [vmem:[%s4733_s1 + $0xdb0] sm:$0xff] %v943_v27 }
  0x70   :  { %946 = vst [vmem:[%s4733_s1 + $0xdc0] sm:$0xff] %v945_v28  ;;  %948 = vst [vmem:[%s4733_s1 + $0xdd0] sm:$0xff] %v947_v29  ;;  %v949_v30 = vld [vmem:[%s4732_s0 + $0xde0] sm:$0xff]  ;;  %v951_v31 = vld [vmem:[%s4732_s0 + $0xdf0] sm:$0xff] }
  0x71   :  { %v953_v32 = vld [vmem:[%s4732_s0 + $0xe00] sm:$0xff]  ;;  %950 = vst [vmem:[%s4733_s1 + $0xde0] sm:$0xff] %v949_v30  ;;  %952 = vst [vmem:[%s4733_s1 + $0xdf0] sm:$0xff] %v951_v31  ;;  %v955_v33 = vld [vmem:[%s4732_s0 + $0xe10] sm:$0xff] }
  0x72   :  { %954 = vst [vmem:[%s4733_s1 + $0xe00] sm:$0xff] %v953_v32  ;;  %v957_v34 = vld [vmem:[%s4732_s0 + $0xe20] sm:$0xff]  ;;  %v959_v35 = vld [vmem:[%s4732_s0 + $0xe30] sm:$0xff]  ;;  %956 = vst [vmem:[%s4733_s1 + $0xe10] sm:$0xff] %v955_v33 }
  0x73   :  { %958 = vst [vmem:[%s4733_s1 + $0xe20] sm:$0xff] %v957_v34  ;;  %960 = vst [vmem:[%s4733_s1 + $0xe30] sm:$0xff] %v959_v35  ;;  %v961_v36 = vld [vmem:[%s4732_s0 + $0xe40] sm:$0xff]  ;;  %v963_v37 = vld [vmem:[%s4732_s0 + $0xe50] sm:$0xff] }
  0x74   :  { %v965_v38 = vld [vmem:[%s4732_s0 + $0xe60] sm:$0xff]  ;;  %962 = vst [vmem:[%s4733_s1 + $0xe40] sm:$0xff] %v961_v36  ;;  %964 = vst [vmem:[%s4733_s1 + $0xe50] sm:$0xff] %v963_v37  ;;  %v967_v39 = vld [vmem:[%s4732_s0 + $0xe70] sm:$0xff] }
  0x75   :  { %966 = vst [vmem:[%s4733_s1 + $0xe60] sm:$0xff] %v965_v38  ;;  %v1471_v40 = vld [vmem:[%s4732_s0 + $0x8] sm:$0x3f]  ;;  %v1473_v41 = vld [vmem:[%s4732_s0 + $0x18] sm:$0x3f]  ;;  %968 = vst [vmem:[%s4733_s1 + $0xe70] sm:$0xff] %v967_v39 }
  0x76   :  { %1472 = vst [vmem:[%s4733_s1 + $0x8] sm:$0x3f] %v1471_v40  ;;  %1474 = vst [vmem:[%s4733_s1 + $0x18] sm:$0x3f] %v1473_v41  ;;  %v1475_v42 = vld [vmem:[%s4732_s0 + $0x28] sm:$0x3f] }
  0x77   :  { %v1477_v43 = vld [vmem:[%s4732_s0 + $0x38] sm:$0x3f]  ;;  %v1479_v44 = vld [vmem:[%s4732_s0 + $0x48] sm:$0x3f]  ;;  %1476 = vst [vmem:[%s4733_s1 + $0x28] sm:$0x3f] %v1475_v42 }
  0x78   :  { %1478 = vst [vmem:[%s4733_s1 + $0x38] sm:$0x3f] %v1477_v43  ;;  %1480 = vst [vmem:[%s4733_s1 + $0x48] sm:$0x3f] %v1479_v44  ;;  %v1481_v45 = vld [vmem:[%s4732_s0 + $0x58] sm:$0x3f] }
  0x79   :  { %v1483_v46 = vld [vmem:[%s4732_s0 + $0x68] sm:$0x3f]  ;;  %v1485_v47 = vld [vmem:[%s4732_s0 + $0x78] sm:$0x3f]  ;;  %1482 = vst [vmem:[%s4733_s1 + $0x58] sm:$0x3f] %v1481_v45 }
  0x7a   :  { %1484 = vst [vmem:[%s4733_s1 + $0x68] sm:$0x3f] %v1483_v46  ;;  %1486 = vst [vmem:[%s4733_s1 + $0x78] sm:$0x3f] %v1485_v47  ;;  %v1487_v48 = vld [vmem:[%s4732_s0 + $0x88] sm:$0x3f] }
  0x7b   :  { %v1489_v49 = vld [vmem:[%s4732_s0 + $0x98] sm:$0x3f]  ;;  %v1491_v50 = vld [vmem:[%s4732_s0 + $0xa8] sm:$0x3f]  ;;  %1488 = vst [vmem:[%s4733_s1 + $0x88] sm:$0x3f] %v1487_v48 }
  0x7c   :  { %1490 = vst [vmem:[%s4733_s1 + $0x98] sm:$0x3f] %v1489_v49  ;;  %1492 = vst [vmem:[%s4733_s1 + $0xa8] sm:$0x3f] %v1491_v50  ;;  %v1493_v51 = vld [vmem:[%s4732_s0 + $0xb8] sm:$0x3f] }
  0x7d   :  { %v1495_v52 = vld [vmem:[%s4732_s0 + $0xc8] sm:$0x3f]  ;;  %v1497_v53 = vld [vmem:[%s4732_s0 + $0xd8] sm:$0x3f]  ;;  %1494 = vst [vmem:[%s4733_s1 + $0xb8] sm:$0x3f] %v1493_v51 }
  0x7e   :  { %1496 = vst [vmem:[%s4733_s1 + $0xc8] sm:$0x3f] %v1495_v52  ;;  %1498 = vst [vmem:[%s4733_s1 + $0xd8] sm:$0x3f] %v1497_v53  ;;  %v1499_v54 = vld [vmem:[%s4732_s0 + $0xe8] sm:$0x3f] }
  0x7f   :  { %v1501_v55 = vld [vmem:[%s4732_s0 + $0xf8] sm:$0x3f]  ;;  %v1503_v56 = vld [vmem:[%s4732_s0 + $0x108] sm:$0x3f]  ;;  %1500 = vst [vmem:[%s4733_s1 + $0xe8] sm:$0x3f] %v1499_v54 }
  0x80   :  { %1502 = vst [vmem:[%s4733_s1 + $0xf8] sm:$0x3f] %v1501_v55  ;;  %1504 = vst [vmem:[%s4733_s1 + $0x108] sm:$0x3f] %v1503_v56  ;;  %v1505_v57 = vld [vmem:[%s4732_s0 + $0x118] sm:$0x3f] }
  0x81   :  { %v1507_v58 = vld [vmem:[%s4732_s0 + $0x128] sm:$0x3f]  ;;  %v1509_v59 = vld [vmem:[%s4732_s0 + $0x138] sm:$0x3f]  ;;  %1506 = vst [vmem:[%s4733_s1 + $0x118] sm:$0x3f] %v1505_v57 }
  0x82   :  { %1508 = vst [vmem:[%s4733_s1 + $0x128] sm:$0x3f] %v1507_v58  ;;  %1510 = vst [vmem:[%s4733_s1 + $0x138] sm:$0x3f] %v1509_v59  ;;  %v1511_v60 = vld [vmem:[%s4732_s0 + $0x148] sm:$0x3f] }
  0x83   :  { %v1513_v61 = vld [vmem:[%s4732_s0 + $0x158] sm:$0x3f]  ;;  %v1515_v62 = vld [vmem:[%s4732_s0 + $0x168] sm:$0x3f]  ;;  %1512 = vst [vmem:[%s4733_s1 + $0x148] sm:$0x3f] %v1511_v60 }
  0x84   :  { %1514 = vst [vmem:[%s4733_s1 + $0x158] sm:$0x3f] %v1513_v61  ;;  %1516 = vst [vmem:[%s4733_s1 + $0x168] sm:$0x3f] %v1515_v62  ;;  %v1517_v63 = vld [vmem:[%s4732_s0 + $0x178] sm:$0x3f] }
  0x85   :  { %v1519_v0 = vld [vmem:[%s4732_s0 + $0x188] sm:$0x3f]  ;;  %v1521_v1 = vld [vmem:[%s4732_s0 + $0x198] sm:$0x3f]  ;;  %1518 = vst [vmem:[%s4733_s1 + $0x178] sm:$0x3f] %v1517_v63 }
  0x86   :  { %1520 = vst [vmem:[%s4733_s1 + $0x188] sm:$0x3f] %v1519_v0  ;;  %1522 = vst [vmem:[%s4733_s1 + $0x198] sm:$0x3f] %v1521_v1  ;;  %v1523_v2 = vld [vmem:[%s4732_s0 + $0x1a8] sm:$0x3f] }
  0x87   :  { %v1525_v3 = vld [vmem:[%s4732_s0 + $0x1b8] sm:$0x3f]  ;;  %v1527_v4 = vld [vmem:[%s4732_s0 + $0x1c8] sm:$0x3f]  ;;  %1524 = vst [vmem:[%s4733_s1 + $0x1a8] sm:$0x3f] %v1523_v2 }
  0x88   :  { %1526 = vst [vmem:[%s4733_s1 + $0x1b8] sm:$0x3f] %v1525_v3  ;;  %1528 = vst [vmem:[%s4733_s1 + $0x1c8] sm:$0x3f] %v1527_v4  ;;  %v1529_v5 = vld [vmem:[%s4732_s0 + $0x1d8] sm:$0x3f] }
  0x89   :  { %v1531_v6 = vld [vmem:[%s4732_s0 + $0x1e8] sm:$0x3f]  ;;  %v1533_v7 = vld [vmem:[%s4732_s0 + $0x1f8] sm:$0x3f]  ;;  %1530 = vst [vmem:[%s4733_s1 + $0x1d8] sm:$0x3f] %v1529_v5 }
  0x8a   :  { %1532 = vst [vmem:[%s4733_s1 + $0x1e8] sm:$0x3f] %v1531_v6  ;;  %1534 = vst [vmem:[%s4733_s1 + $0x1f8] sm:$0x3f] %v1533_v7  ;;  %v1535_v8 = vld [vmem:[%s4732_s0 + $0x208] sm:$0x3f] }
  0x8b   :  { %v1537_v9 = vld [vmem:[%s4732_s0 + $0x218] sm:$0x3f]  ;;  %v1539_v10 = vld [vmem:[%s4732_s0 + $0x228] sm:$0x3f]  ;;  %1536 = vst [vmem:[%s4733_s1 + $0x208] sm:$0x3f] %v1535_v8 }
  0x8c   :  { %1538 = vst [vmem:[%s4733_s1 + $0x218] sm:$0x3f] %v1537_v9  ;;  %1540 = vst [vmem:[%s4733_s1 + $0x228] sm:$0x3f] %v1539_v10  ;;  %v1541_v11 = vld [vmem:[%s4732_s0 + $0x238] sm:$0x3f] }
  0x8d   :  { %v1543_v12 = vld [vmem:[%s4732_s0 + $0x248] sm:$0x3f]  ;;  %v1545_v13 = vld [vmem:[%s4732_s0 + $0x258] sm:$0x3f]  ;;  %1542 = vst [vmem:[%s4733_s1 + $0x238] sm:$0x3f] %v1541_v11 }
  0x8e   :  { %1544 = vst [vmem:[%s4733_s1 + $0x248] sm:$0x3f] %v1543_v12  ;;  %1546 = vst [vmem:[%s4733_s1 + $0x258] sm:$0x3f] %v1545_v13  ;;  %v1547_v14 = vld [vmem:[%s4732_s0 + $0x268] sm:$0x3f] }
  0x8f   :  { %v1549_v15 = vld [vmem:[%s4732_s0 + $0x278] sm:$0x3f]  ;;  %v1551_v16 = vld [vmem:[%s4732_s0 + $0x288] sm:$0x3f]  ;;  %1548 = vst [vmem:[%s4733_s1 + $0x268] sm:$0x3f] %v1547_v14 }
  0x90   :  { %1550 = vst [vmem:[%s4733_s1 + $0x278] sm:$0x3f] %v1549_v15  ;;  %1552 = vst [vmem:[%s4733_s1 + $0x288] sm:$0x3f] %v1551_v16  ;;  %v1553_v17 = vld [vmem:[%s4732_s0 + $0x298] sm:$0x3f] }
  0x91   :  { %v1555_v18 = vld [vmem:[%s4732_s0 + $0x2a8] sm:$0x3f]  ;;  %v1557_v19 = vld [vmem:[%s4732_s0 + $0x2b8] sm:$0x3f]  ;;  %1554 = vst [vmem:[%s4733_s1 + $0x298] sm:$0x3f] %v1553_v17 }
  0x92   :  { %1556 = vst [vmem:[%s4733_s1 + $0x2a8] sm:$0x3f] %v1555_v18  ;;  %1558 = vst [vmem:[%s4733_s1 + $0x2b8] sm:$0x3f] %v1557_v19  ;;  %v1559_v20 = vld [vmem:[%s4732_s0 + $0x2c8] sm:$0x3f] }
  0x93   :  { %v1561_v21 = vld [vmem:[%s4732_s0 + $0x2d8] sm:$0x3f]  ;;  %v1563_v22 = vld [vmem:[%s4732_s0 + $0x2e8] sm:$0x3f]  ;;  %1560 = vst [vmem:[%s4733_s1 + $0x2c8] sm:$0x3f] %v1559_v20 }
  0x94   :  { %1562 = vst [vmem:[%s4733_s1 + $0x2d8] sm:$0x3f] %v1561_v21  ;;  %1564 = vst [vmem:[%s4733_s1 + $0x2e8] sm:$0x3f] %v1563_v22  ;;  %v1565_v23 = vld [vmem:[%s4732_s0 + $0x2f8] sm:$0x3f] }
  0x95   :  { %v1567_v24 = vld [vmem:[%s4732_s0 + $0x308] sm:$0x3f]  ;;  %v1569_v25 = vld [vmem:[%s4732_s0 + $0x318] sm:$0x3f]  ;;  %1566 = vst [vmem:[%s4733_s1 + $0x2f8] sm:$0x3f] %v1565_v23 }
  0x96   :  { %1568 = vst [vmem:[%s4733_s1 + $0x308] sm:$0x3f] %v1567_v24  ;;  %1570 = vst [vmem:[%s4733_s1 + $0x318] sm:$0x3f] %v1569_v25  ;;  %v1571_v26 = vld [vmem:[%s4732_s0 + $0x328] sm:$0x3f] }
  0x97   :  { %v1573_v27 = vld [vmem:[%s4732_s0 + $0x338] sm:$0x3f]  ;;  %v1575_v28 = vld [vmem:[%s4732_s0 + $0x348] sm:$0x3f]  ;;  %1572 = vst [vmem:[%s4733_s1 + $0x328] sm:$0x3f] %v1571_v26 }
  0x98   :  { %1574 = vst [vmem:[%s4733_s1 + $0x338] sm:$0x3f] %v1573_v27  ;;  %1576 = vst [vmem:[%s4733_s1 + $0x348] sm:$0x3f] %v1575_v28  ;;  %v1577_v29 = vld [vmem:[%s4732_s0 + $0x358] sm:$0x3f] }
  0x99   :  { %v1579_v30 = vld [vmem:[%s4732_s0 + $0x368] sm:$0x3f]  ;;  %v1581_v31 = vld [vmem:[%s4732_s0 + $0x378] sm:$0x3f]  ;;  %1578 = vst [vmem:[%s4733_s1 + $0x358] sm:$0x3f] %v1577_v29 }
  0x9a   :  { %1580 = vst [vmem:[%s4733_s1 + $0x368] sm:$0x3f] %v1579_v30  ;;  %1582 = vst [vmem:[%s4733_s1 + $0x378] sm:$0x3f] %v1581_v31  ;;  %v1583_v32 = vld [vmem:[%s4732_s0 + $0x388] sm:$0x3f] }
  0x9b   :  { %v1585_v33 = vld [vmem:[%s4732_s0 + $0x398] sm:$0x3f]  ;;  %v1587_v34 = vld [vmem:[%s4732_s0 + $0x3a8] sm:$0x3f]  ;;  %1584 = vst [vmem:[%s4733_s1 + $0x388] sm:$0x3f] %v1583_v32 }
  0x9c   :  { %1586 = vst [vmem:[%s4733_s1 + $0x398] sm:$0x3f] %v1585_v33  ;;  %1588 = vst [vmem:[%s4733_s1 + $0x3a8] sm:$0x3f] %v1587_v34  ;;  %v1589_v35 = vld [vmem:[%s4732_s0 + $0x3b8] sm:$0x3f] }
  0x9d   :  { %v1591_v36 = vld [vmem:[%s4732_s0 + $0x3c8] sm:$0x3f]  ;;  %v1593_v37 = vld [vmem:[%s4732_s0 + $0x3d8] sm:$0x3f]  ;;  %1590 = vst [vmem:[%s4733_s1 + $0x3b8] sm:$0x3f] %v1589_v35 }
  0x9e   :  { %1592 = vst [vmem:[%s4733_s1 + $0x3c8] sm:$0x3f] %v1591_v36  ;;  %1594 = vst [vmem:[%s4733_s1 + $0x3d8] sm:$0x3f] %v1593_v37  ;;  %v1595_v38 = vld [vmem:[%s4732_s0 + $0x3e8] sm:$0x3f] }
  0x9f   :  { %v1597_v39 = vld [vmem:[%s4732_s0 + $0x3f8] sm:$0x3f]  ;;  %v1599_v40 = vld [vmem:[%s4732_s0 + $0x408] sm:$0x3f]  ;;  %1596 = vst [vmem:[%s4733_s1 + $0x3e8] sm:$0x3f] %v1595_v38 }
  0xa0   :  { %1598 = vst [vmem:[%s4733_s1 + $0x3f8] sm:$0x3f] %v1597_v39  ;;  %1600 = vst [vmem:[%s4733_s1 + $0x408] sm:$0x3f] %v1599_v40  ;;  %v1601_v41 = vld [vmem:[%s4732_s0 + $0x418] sm:$0x3f] }
  0xa1   :  { %v1603_v42 = vld [vmem:[%s4732_s0 + $0x428] sm:$0x3f]  ;;  %v1605_v43 = vld [vmem:[%s4732_s0 + $0x438] sm:$0x3f]  ;;  %1602 = vst [vmem:[%s4733_s1 + $0x418] sm:$0x3f] %v1601_v41 }
  0xa2   :  { %1604 = vst [vmem:[%s4733_s1 + $0x428] sm:$0x3f] %v1603_v42  ;;  %1606 = vst [vmem:[%s4733_s1 + $0x438] sm:$0x3f] %v1605_v43  ;;  %v1607_v44 = vld [vmem:[%s4732_s0 + $0x448] sm:$0x3f] }
  0xa3   :  { %v1609_v45 = vld [vmem:[%s4732_s0 + $0x458] sm:$0x3f]  ;;  %v1611_v46 = vld [vmem:[%s4732_s0 + $0x468] sm:$0x3f]  ;;  %1608 = vst [vmem:[%s4733_s1 + $0x448] sm:$0x3f] %v1607_v44 }
  0xa4   :  { %1610 = vst [vmem:[%s4733_s1 + $0x458] sm:$0x3f] %v1609_v45  ;;  %1612 = vst [vmem:[%s4733_s1 + $0x468] sm:$0x3f] %v1611_v46  ;;  %v1613_v47 = vld [vmem:[%s4732_s0 + $0x478] sm:$0x3f] }
  0xa5   :  { %v1615_v48 = vld [vmem:[%s4732_s0 + $0x488] sm:$0x3f]  ;;  %v1617_v49 = vld [vmem:[%s4732_s0 + $0x498] sm:$0x3f]  ;;  %1614 = vst [vmem:[%s4733_s1 + $0x478] sm:$0x3f] %v1613_v47 }
  0xa6   :  { %1616 = vst [vmem:[%s4733_s1 + $0x488] sm:$0x3f] %v1615_v48  ;;  %1618 = vst [vmem:[%s4733_s1 + $0x498] sm:$0x3f] %v1617_v49  ;;  %v1619_v50 = vld [vmem:[%s4732_s0 + $0x4a8] sm:$0x3f] }
  0xa7   :  { %v1621_v51 = vld [vmem:[%s4732_s0 + $0x4b8] sm:$0x3f]  ;;  %v1623_v52 = vld [vmem:[%s4732_s0 + $0x4c8] sm:$0x3f]  ;;  %1620 = vst [vmem:[%s4733_s1 + $0x4a8] sm:$0x3f] %v1619_v50 }
  0xa8   :  { %1622 = vst [vmem:[%s4733_s1 + $0x4b8] sm:$0x3f] %v1621_v51  ;;  %1624 = vst [vmem:[%s4733_s1 + $0x4c8] sm:$0x3f] %v1623_v52  ;;  %v1625_v53 = vld [vmem:[%s4732_s0 + $0x4d8] sm:$0x3f] }
  0xa9   :  { %v1627_v54 = vld [vmem:[%s4732_s0 + $0x4e8] sm:$0x3f]  ;;  %v1629_v55 = vld [vmem:[%s4732_s0 + $0x4f8] sm:$0x3f]  ;;  %1626 = vst [vmem:[%s4733_s1 + $0x4d8] sm:$0x3f] %v1625_v53 }
  0xaa   :  { %1628 = vst [vmem:[%s4733_s1 + $0x4e8] sm:$0x3f] %v1627_v54  ;;  %1630 = vst [vmem:[%s4733_s1 + $0x4f8] sm:$0x3f] %v1629_v55  ;;  %v1631_v56 = vld [vmem:[%s4732_s0 + $0x508] sm:$0x3f] }
  0xab   :  { %v1633_v57 = vld [vmem:[%s4732_s0 + $0x518] sm:$0x3f]  ;;  %v1635_v58 = vld [vmem:[%s4732_s0 + $0x528] sm:$0x3f]  ;;  %1632 = vst [vmem:[%s4733_s1 + $0x508] sm:$0x3f] %v1631_v56 }
  0xac   :  { %1634 = vst [vmem:[%s4733_s1 + $0x518] sm:$0x3f] %v1633_v57  ;;  %1636 = vst [vmem:[%s4733_s1 + $0x528] sm:$0x3f] %v1635_v58  ;;  %v1637_v59 = vld [vmem:[%s4732_s0 + $0x538] sm:$0x3f] }
  0xad   :  { %v1639_v60 = vld [vmem:[%s4732_s0 + $0x548] sm:$0x3f]  ;;  %v1641_v61 = vld [vmem:[%s4732_s0 + $0x558] sm:$0x3f]  ;;  %1638 = vst [vmem:[%s4733_s1 + $0x538] sm:$0x3f] %v1637_v59 }
  0xae   :  { %1640 = vst [vmem:[%s4733_s1 + $0x548] sm:$0x3f] %v1639_v60  ;;  %1642 = vst [vmem:[%s4733_s1 + $0x558] sm:$0x3f] %v1641_v61  ;;  %v1643_v62 = vld [vmem:[%s4732_s0 + $0x568] sm:$0x3f] }
  0xaf   :  { %v1645_v63 = vld [vmem:[%s4732_s0 + $0x578] sm:$0x3f]  ;;  %v1647_v0 = vld [vmem:[%s4732_s0 + $0x588] sm:$0x3f]  ;;  %1644 = vst [vmem:[%s4733_s1 + $0x568] sm:$0x3f] %v1643_v62 }
  0xb0   :  { %1646 = vst [vmem:[%s4733_s1 + $0x578] sm:$0x3f] %v1645_v63  ;;  %1648 = vst [vmem:[%s4733_s1 + $0x588] sm:$0x3f] %v1647_v0  ;;  %v1649_v1 = vld [vmem:[%s4732_s0 + $0x598] sm:$0x3f] }
  0xb1   :  { %v1651_v2 = vld [vmem:[%s4732_s0 + $0x5a8] sm:$0x3f]  ;;  %v1653_v3 = vld [vmem:[%s4732_s0 + $0x5b8] sm:$0x3f]  ;;  %1650 = vst [vmem:[%s4733_s1 + $0x598] sm:$0x3f] %v1649_v1 }
  0xb2   :  { %1652 = vst [vmem:[%s4733_s1 + $0x5a8] sm:$0x3f] %v1651_v2  ;;  %1654 = vst [vmem:[%s4733_s1 + $0x5b8] sm:$0x3f] %v1653_v3  ;;  %v1655_v4 = vld [vmem:[%s4732_s0 + $0x5c8] sm:$0x3f] }
  0xb3   :  { %v1657_v5 = vld [vmem:[%s4732_s0 + $0x5d8] sm:$0x3f]  ;;  %v1659_v6 = vld [vmem:[%s4732_s0 + $0x5e8] sm:$0x3f]  ;;  %1656 = vst [vmem:[%s4733_s1 + $0x5c8] sm:$0x3f] %v1655_v4 }
  0xb4   :  { %1658 = vst [vmem:[%s4733_s1 + $0x5d8] sm:$0x3f] %v1657_v5  ;;  %1660 = vst [vmem:[%s4733_s1 + $0x5e8] sm:$0x3f] %v1659_v6  ;;  %v1661_v7 = vld [vmem:[%s4732_s0 + $0x5f8] sm:$0x3f] }
  0xb5   :  { %v1663_v8 = vld [vmem:[%s4732_s0 + $0x608] sm:$0x3f]  ;;  %v1665_v9 = vld [vmem:[%s4732_s0 + $0x618] sm:$0x3f]  ;;  %1662 = vst [vmem:[%s4733_s1 + $0x5f8] sm:$0x3f] %v1661_v7 }
  0xb6   :  { %1664 = vst [vmem:[%s4733_s1 + $0x608] sm:$0x3f] %v1663_v8  ;;  %1666 = vst [vmem:[%s4733_s1 + $0x618] sm:$0x3f] %v1665_v9  ;;  %v1667_v10 = vld [vmem:[%s4732_s0 + $0x628] sm:$0x3f] }
  0xb7   :  { %v1669_v11 = vld [vmem:[%s4732_s0 + $0x638] sm:$0x3f]  ;;  %v1671_v12 = vld [vmem:[%s4732_s0 + $0x648] sm:$0x3f]  ;;  %1668 = vst [vmem:[%s4733_s1 + $0x628] sm:$0x3f] %v1667_v10 }
  0xb8   :  { %1670 = vst [vmem:[%s4733_s1 + $0x638] sm:$0x3f] %v1669_v11  ;;  %1672 = vst [vmem:[%s4733_s1 + $0x648] sm:$0x3f] %v1671_v12  ;;  %v1673_v13 = vld [vmem:[%s4732_s0 + $0x658] sm:$0x3f] }
  0xb9   :  { %v1675_v14 = vld [vmem:[%s4732_s0 + $0x668] sm:$0x3f]  ;;  %v1677_v15 = vld [vmem:[%s4732_s0 + $0x678] sm:$0x3f]  ;;  %1674 = vst [vmem:[%s4733_s1 + $0x658] sm:$0x3f] %v1673_v13 }
  0xba   :  { %1676 = vst [vmem:[%s4733_s1 + $0x668] sm:$0x3f] %v1675_v14  ;;  %1678 = vst [vmem:[%s4733_s1 + $0x678] sm:$0x3f] %v1677_v15  ;;  %v1679_v16 = vld [vmem:[%s4732_s0 + $0x688] sm:$0x3f] }
  0xbb   :  { %v1681_v17 = vld [vmem:[%s4732_s0 + $0x698] sm:$0x3f]  ;;  %v1683_v18 = vld [vmem:[%s4732_s0 + $0x6a8] sm:$0x3f]  ;;  %1680 = vst [vmem:[%s4733_s1 + $0x688] sm:$0x3f] %v1679_v16 }
  0xbc   :  { %1682 = vst [vmem:[%s4733_s1 + $0x698] sm:$0x3f] %v1681_v17  ;;  %1684 = vst [vmem:[%s4733_s1 + $0x6a8] sm:$0x3f] %v1683_v18  ;;  %v1685_v19 = vld [vmem:[%s4732_s0 + $0x6b8] sm:$0x3f] }
  0xbd   :  { %v1687_v20 = vld [vmem:[%s4732_s0 + $0x6c8] sm:$0x3f]  ;;  %v1689_v21 = vld [vmem:[%s4732_s0 + $0x6d8] sm:$0x3f]  ;;  %1686 = vst [vmem:[%s4733_s1 + $0x6b8] sm:$0x3f] %v1685_v19 }
  0xbe   :  { %1688 = vst [vmem:[%s4733_s1 + $0x6c8] sm:$0x3f] %v1687_v20  ;;  %1690 = vst [vmem:[%s4733_s1 + $0x6d8] sm:$0x3f] %v1689_v21  ;;  %v1691_v22 = vld [vmem:[%s4732_s0 + $0x6e8] sm:$0x3f] }
  0xbf   :  { %v1693_v23 = vld [vmem:[%s4732_s0 + $0x6f8] sm:$0x3f]  ;;  %v1695_v24 = vld [vmem:[%s4732_s0 + $0x708] sm:$0x3f]  ;;  %1692 = vst [vmem:[%s4733_s1 + $0x6e8] sm:$0x3f] %v1691_v22 }
  0xc0   :  { %1694 = vst [vmem:[%s4733_s1 + $0x6f8] sm:$0x3f] %v1693_v23  ;;  %1696 = vst [vmem:[%s4733_s1 + $0x708] sm:$0x3f] %v1695_v24  ;;  %v1697_v25 = vld [vmem:[%s4732_s0 + $0x718] sm:$0x3f] }
  0xc1   :  { %v1699_v26 = vld [vmem:[%s4732_s0 + $0x728] sm:$0x3f]  ;;  %v1701_v27 = vld [vmem:[%s4732_s0 + $0x738] sm:$0x3f]  ;;  %1698 = vst [vmem:[%s4733_s1 + $0x718] sm:$0x3f] %v1697_v25 }
  0xc2   :  { %1700 = vst [vmem:[%s4733_s1 + $0x728] sm:$0x3f] %v1699_v26  ;;  %1702 = vst [vmem:[%s4733_s1 + $0x738] sm:$0x3f] %v1701_v27  ;;  %v1703_v28 = vld [vmem:[%s4732_s0 + $0x748] sm:$0x3f] }
  0xc3   :  { %v1705_v29 = vld [vmem:[%s4732_s0 + $0x758] sm:$0x3f]  ;;  %v1707_v30 = vld [vmem:[%s4732_s0 + $0x768] sm:$0x3f]  ;;  %1704 = vst [vmem:[%s4733_s1 + $0x748] sm:$0x3f] %v1703_v28 }
  0xc4   :  { %1706 = vst [vmem:[%s4733_s1 + $0x758] sm:$0x3f] %v1705_v29  ;;  %1708 = vst [vmem:[%s4733_s1 + $0x768] sm:$0x3f] %v1707_v30  ;;  %v1709_v31 = vld [vmem:[%s4732_s0 + $0x778] sm:$0x3f] }
  0xc5   :  { %v1711_v32 = vld [vmem:[%s4732_s0 + $0x788] sm:$0x3f]  ;;  %v1713_v33 = vld [vmem:[%s4732_s0 + $0x798] sm:$0x3f]  ;;  %1710 = vst [vmem:[%s4733_s1 + $0x778] sm:$0x3f] %v1709_v31 }
  0xc6   :  { %1712 = vst [vmem:[%s4733_s1 + $0x788] sm:$0x3f] %v1711_v32  ;;  %1714 = vst [vmem:[%s4733_s1 + $0x798] sm:$0x3f] %v1713_v33  ;;  %v1715_v34 = vld [vmem:[%s4732_s0 + $0x7a8] sm:$0x3f] }
  0xc7   :  { %v1717_v35 = vld [vmem:[%s4732_s0 + $0x7b8] sm:$0x3f]  ;;  %v1719_v36 = vld [vmem:[%s4732_s0 + $0x7c8] sm:$0x3f]  ;;  %1716 = vst [vmem:[%s4733_s1 + $0x7a8] sm:$0x3f] %v1715_v34 }
  0xc8   :  { %1718 = vst [vmem:[%s4733_s1 + $0x7b8] sm:$0x3f] %v1717_v35  ;;  %1720 = vst [vmem:[%s4733_s1 + $0x7c8] sm:$0x3f] %v1719_v36  ;;  %v1721_v37 = vld [vmem:[%s4732_s0 + $0x7d8] sm:$0x3f] }
  0xc9   :  { %v1723_v38 = vld [vmem:[%s4732_s0 + $0x7e8] sm:$0x3f]  ;;  %v1725_v39 = vld [vmem:[%s4732_s0 + $0x7f8] sm:$0x3f]  ;;  %1722 = vst [vmem:[%s4733_s1 + $0x7d8] sm:$0x3f] %v1721_v37 }
  0xca   :  { %1724 = vst [vmem:[%s4733_s1 + $0x7e8] sm:$0x3f] %v1723_v38  ;;  %1726 = vst [vmem:[%s4733_s1 + $0x7f8] sm:$0x3f] %v1725_v39  ;;  %v1727_v40 = vld [vmem:[%s4732_s0 + $0x808] sm:$0x3f] }
  0xcb   :  { %v1729_v41 = vld [vmem:[%s4732_s0 + $0x818] sm:$0x3f]  ;;  %v1731_v42 = vld [vmem:[%s4732_s0 + $0x828] sm:$0x3f]  ;;  %1728 = vst [vmem:[%s4733_s1 + $0x808] sm:$0x3f] %v1727_v40 }
  0xcc   :  { %1730 = vst [vmem:[%s4733_s1 + $0x818] sm:$0x3f] %v1729_v41  ;;  %1732 = vst [vmem:[%s4733_s1 + $0x828] sm:$0x3f] %v1731_v42  ;;  %v1733_v43 = vld [vmem:[%s4732_s0 + $0x838] sm:$0x3f] }
  0xcd   :  { %v1735_v44 = vld [vmem:[%s4732_s0 + $0x848] sm:$0x3f]  ;;  %v1737_v45 = vld [vmem:[%s4732_s0 + $0x858] sm:$0x3f]  ;;  %1734 = vst [vmem:[%s4733_s1 + $0x838] sm:$0x3f] %v1733_v43 }
  0xce   :  { %1736 = vst [vmem:[%s4733_s1 + $0x848] sm:$0x3f] %v1735_v44  ;;  %1738 = vst [vmem:[%s4733_s1 + $0x858] sm:$0x3f] %v1737_v45  ;;  %v1739_v46 = vld [vmem:[%s4732_s0 + $0x868] sm:$0x3f] }
  0xcf   :  { %v1741_v47 = vld [vmem:[%s4732_s0 + $0x878] sm:$0x3f]  ;;  %v1743_v48 = vld [vmem:[%s4732_s0 + $0x888] sm:$0x3f]  ;;  %1740 = vst [vmem:[%s4733_s1 + $0x868] sm:$0x3f] %v1739_v46 }
  0xd0   :  { %1742 = vst [vmem:[%s4733_s1 + $0x878] sm:$0x3f] %v1741_v47  ;;  %1744 = vst [vmem:[%s4733_s1 + $0x888] sm:$0x3f] %v1743_v48  ;;  %v1745_v49 = vld [vmem:[%s4732_s0 + $0x898] sm:$0x3f] }
  0xd1   :  { %v1747_v50 = vld [vmem:[%s4732_s0 + $0x8a8] sm:$0x3f]  ;;  %v1749_v51 = vld [vmem:[%s4732_s0 + $0x8b8] sm:$0x3f]  ;;  %1746 = vst [vmem:[%s4733_s1 + $0x898] sm:$0x3f] %v1745_v49 }
  0xd2   :  { %1748 = vst [vmem:[%s4733_s1 + $0x8a8] sm:$0x3f] %v1747_v50  ;;  %1750 = vst [vmem:[%s4733_s1 + $0x8b8] sm:$0x3f] %v1749_v51  ;;  %v1751_v52 = vld [vmem:[%s4732_s0 + $0x8c8] sm:$0x3f] }
  0xd3   :  { %v1753_v53 = vld [vmem:[%s4732_s0 + $0x8d8] sm:$0x3f]  ;;  %v1755_v54 = vld [vmem:[%s4732_s0 + $0x8e8] sm:$0x3f]  ;;  %1752 = vst [vmem:[%s4733_s1 + $0x8c8] sm:$0x3f] %v1751_v52 }
  0xd4   :  { %1754 = vst [vmem:[%s4733_s1 + $0x8d8] sm:$0x3f] %v1753_v53  ;;  %1756 = vst [vmem:[%s4733_s1 + $0x8e8] sm:$0x3f] %v1755_v54  ;;  %v1757_v55 = vld [vmem:[%s4732_s0 + $0x8f8] sm:$0x3f] }
  0xd5   :  { %v1759_v56 = vld [vmem:[%s4732_s0 + $0x908] sm:$0x3f]  ;;  %v1761_v57 = vld [vmem:[%s4732_s0 + $0x918] sm:$0x3f]  ;;  %1758 = vst [vmem:[%s4733_s1 + $0x8f8] sm:$0x3f] %v1757_v55 }
  0xd6   :  { %1760 = vst [vmem:[%s4733_s1 + $0x908] sm:$0x3f] %v1759_v56  ;;  %1762 = vst [vmem:[%s4733_s1 + $0x918] sm:$0x3f] %v1761_v57  ;;  %v1763_v58 = vld [vmem:[%s4732_s0 + $0x928] sm:$0x3f] }
  0xd7   :  { %v1765_v59 = vld [vmem:[%s4732_s0 + $0x938] sm:$0x3f]  ;;  %v1767_v60 = vld [vmem:[%s4732_s0 + $0x948] sm:$0x3f]  ;;  %1764 = vst [vmem:[%s4733_s1 + $0x928] sm:$0x3f] %v1763_v58 }
  0xd8   :  { %1766 = vst [vmem:[%s4733_s1 + $0x938] sm:$0x3f] %v1765_v59  ;;  %1768 = vst [vmem:[%s4733_s1 + $0x948] sm:$0x3f] %v1767_v60  ;;  %v1769_v61 = vld [vmem:[%s4732_s0 + $0x958] sm:$0x3f] }
  0xd9   :  { %v1771_v62 = vld [vmem:[%s4732_s0 + $0x968] sm:$0x3f]  ;;  %v1773_v63 = vld [vmem:[%s4732_s0 + $0x978] sm:$0x3f]  ;;  %1770 = vst [vmem:[%s4733_s1 + $0x958] sm:$0x3f] %v1769_v61 }
  0xda   :  { %1772 = vst [vmem:[%s4733_s1 + $0x968] sm:$0x3f] %v1771_v62  ;;  %1774 = vst [vmem:[%s4733_s1 + $0x978] sm:$0x3f] %v1773_v63  ;;  %v1775_v0 = vld [vmem:[%s4732_s0 + $0x988] sm:$0x3f] }
  0xdb   :  { %v1777_v1 = vld [vmem:[%s4732_s0 + $0x998] sm:$0x3f]  ;;  %v1779_v2 = vld [vmem:[%s4732_s0 + $0x9a8] sm:$0x3f]  ;;  %1776 = vst [vmem:[%s4733_s1 + $0x988] sm:$0x3f] %v1775_v0 }
  0xdc   :  { %1778 = vst [vmem:[%s4733_s1 + $0x998] sm:$0x3f] %v1777_v1  ;;  %1780 = vst [vmem:[%s4733_s1 + $0x9a8] sm:$0x3f] %v1779_v2  ;;  %v1781_v3 = vld [vmem:[%s4732_s0 + $0x9b8] sm:$0x3f] }
  0xdd   :  { %v1783_v4 = vld [vmem:[%s4732_s0 + $0x9c8] sm:$0x3f]  ;;  %v1785_v5 = vld [vmem:[%s4732_s0 + $0x9d8] sm:$0x3f]  ;;  %1782 = vst [vmem:[%s4733_s1 + $0x9b8] sm:$0x3f] %v1781_v3 }
  0xde   :  { %1784 = vst [vmem:[%s4733_s1 + $0x9c8] sm:$0x3f] %v1783_v4  ;;  %1786 = vst [vmem:[%s4733_s1 + $0x9d8] sm:$0x3f] %v1785_v5  ;;  %v1787_v6 = vld [vmem:[%s4732_s0 + $0x9e8] sm:$0x3f] }
  0xdf   :  { %v1789_v7 = vld [vmem:[%s4732_s0 + $0x9f8] sm:$0x3f]  ;;  %v1791_v8 = vld [vmem:[%s4732_s0 + $0xa08] sm:$0x3f]  ;;  %1788 = vst [vmem:[%s4733_s1 + $0x9e8] sm:$0x3f] %v1787_v6 }
  0xe0   :  { %1790 = vst [vmem:[%s4733_s1 + $0x9f8] sm:$0x3f] %v1789_v7  ;;  %1792 = vst [vmem:[%s4733_s1 + $0xa08] sm:$0x3f] %v1791_v8  ;;  %v1793_v9 = vld [vmem:[%s4732_s0 + $0xa18] sm:$0x3f] }
  0xe1   :  { %v1795_v10 = vld [vmem:[%s4732_s0 + $0xa28] sm:$0x3f]  ;;  %v1797_v11 = vld [vmem:[%s4732_s0 + $0xa38] sm:$0x3f]  ;;  %1794 = vst [vmem:[%s4733_s1 + $0xa18] sm:$0x3f] %v1793_v9 }
  0xe2   :  { %1796 = vst [vmem:[%s4733_s1 + $0xa28] sm:$0x3f] %v1795_v10  ;;  %1798 = vst [vmem:[%s4733_s1 + $0xa38] sm:$0x3f] %v1797_v11  ;;  %v1799_v12 = vld [vmem:[%s4732_s0 + $0xa48] sm:$0x3f] }
  0xe3   :  { %v1801_v13 = vld [vmem:[%s4732_s0 + $0xa58] sm:$0x3f]  ;;  %v1803_v14 = vld [vmem:[%s4732_s0 + $0xa68] sm:$0x3f]  ;;  %1800 = vst [vmem:[%s4733_s1 + $0xa48] sm:$0x3f] %v1799_v12 }
  0xe4   :  { %1802 = vst [vmem:[%s4733_s1 + $0xa58] sm:$0x3f] %v1801_v13  ;;  %1804 = vst [vmem:[%s4733_s1 + $0xa68] sm:$0x3f] %v1803_v14  ;;  %v1805_v15 = vld [vmem:[%s4732_s0 + $0xa78] sm:$0x3f] }
  0xe5   :  { %v1807_v16 = vld [vmem:[%s4732_s0 + $0xa88] sm:$0x3f]  ;;  %v1809_v17 = vld [vmem:[%s4732_s0 + $0xa98] sm:$0x3f]  ;;  %1806 = vst [vmem:[%s4733_s1 + $0xa78] sm:$0x3f] %v1805_v15 }
  0xe6   :  { %1808 = vst [vmem:[%s4733_s1 + $0xa88] sm:$0x3f] %v1807_v16  ;;  %1810 = vst [vmem:[%s4733_s1 + $0xa98] sm:$0x3f] %v1809_v17  ;;  %v1811_v18 = vld [vmem:[%s4732_s0 + $0xaa8] sm:$0x3f] }
  0xe7   :  { %v1813_v19 = vld [vmem:[%s4732_s0 + $0xab8] sm:$0x3f]  ;;  %v1815_v20 = vld [vmem:[%s4732_s0 + $0xac8] sm:$0x3f]  ;;  %1812 = vst [vmem:[%s4733_s1 + $0xaa8] sm:$0x3f] %v1811_v18 }
  0xe8   :  { %1814 = vst [vmem:[%s4733_s1 + $0xab8] sm:$0x3f] %v1813_v19  ;;  %1816 = vst [vmem:[%s4733_s1 + $0xac8] sm:$0x3f] %v1815_v20  ;;  %v1817_v21 = vld [vmem:[%s4732_s0 + $0xad8] sm:$0x3f] }
  0xe9   :  { %v1819_v22 = vld [vmem:[%s4732_s0 + $0xae8] sm:$0x3f]  ;;  %v1821_v23 = vld [vmem:[%s4732_s0 + $0xaf8] sm:$0x3f]  ;;  %1818 = vst [vmem:[%s4733_s1 + $0xad8] sm:$0x3f] %v1817_v21 }
  0xea   :  { %1820 = vst [vmem:[%s4733_s1 + $0xae8] sm:$0x3f] %v1819_v22  ;;  %1822 = vst [vmem:[%s4733_s1 + $0xaf8] sm:$0x3f] %v1821_v23  ;;  %v1823_v24 = vld [vmem:[%s4732_s0 + $0xb08] sm:$0x3f] }
  0xeb   :  { %v1825_v25 = vld [vmem:[%s4732_s0 + $0xb18] sm:$0x3f]  ;;  %v1827_v26 = vld [vmem:[%s4732_s0 + $0xb28] sm:$0x3f]  ;;  %1824 = vst [vmem:[%s4733_s1 + $0xb08] sm:$0x3f] %v1823_v24 }
  0xec   :  { %1826 = vst [vmem:[%s4733_s1 + $0xb18] sm:$0x3f] %v1825_v25  ;;  %1828 = vst [vmem:[%s4733_s1 + $0xb28] sm:$0x3f] %v1827_v26  ;;  %v1829_v27 = vld [vmem:[%s4732_s0 + $0xb38] sm:$0x3f] }
  0xed   :  { %v1831_v28 = vld [vmem:[%s4732_s0 + $0xb48] sm:$0x3f]  ;;  %v1833_v29 = vld [vmem:[%s4732_s0 + $0xb58] sm:$0x3f]  ;;  %1830 = vst [vmem:[%s4733_s1 + $0xb38] sm:$0x3f] %v1829_v27 }
  0xee   :  { %1832 = vst [vmem:[%s4733_s1 + $0xb48] sm:$0x3f] %v1831_v28  ;;  %1834 = vst [vmem:[%s4733_s1 + $0xb58] sm:$0x3f] %v1833_v29  ;;  %v1835_v30 = vld [vmem:[%s4732_s0 + $0xb68] sm:$0x3f] }
  0xef   :  { %v1837_v31 = vld [vmem:[%s4732_s0 + $0xb78] sm:$0x3f]  ;;  %v1839_v32 = vld [vmem:[%s4732_s0 + $0xb88] sm:$0x3f]  ;;  %1836 = vst [vmem:[%s4733_s1 + $0xb68] sm:$0x3f] %v1835_v30 }
  0xf0   :  { %1838 = vst [vmem:[%s4733_s1 + $0xb78] sm:$0x3f] %v1837_v31  ;;  %1840 = vst [vmem:[%s4733_s1 + $0xb88] sm:$0x3f] %v1839_v32  ;;  %v1841_v33 = vld [vmem:[%s4732_s0 + $0xb98] sm:$0x3f] }
  0xf1   :  { %v1843_v34 = vld [vmem:[%s4732_s0 + $0xba8] sm:$0x3f]  ;;  %v1845_v35 = vld [vmem:[%s4732_s0 + $0xbb8] sm:$0x3f]  ;;  %1842 = vst [vmem:[%s4733_s1 + $0xb98] sm:$0x3f] %v1841_v33 }
  0xf2   :  { %1844 = vst [vmem:[%s4733_s1 + $0xba8] sm:$0x3f] %v1843_v34  ;;  %1846 = vst [vmem:[%s4733_s1 + $0xbb8] sm:$0x3f] %v1845_v35  ;;  %v1847_v36 = vld [vmem:[%s4732_s0 + $0xbc8] sm:$0x3f] }
  0xf3   :  { %v1849_v37 = vld [vmem:[%s4732_s0 + $0xbd8] sm:$0x3f]  ;;  %v1851_v38 = vld [vmem:[%s4732_s0 + $0xbe8] sm:$0x3f]  ;;  %1848 = vst [vmem:[%s4733_s1 + $0xbc8] sm:$0x3f] %v1847_v36 }
  0xf4   :  { %1850 = vst [vmem:[%s4733_s1 + $0xbd8] sm:$0x3f] %v1849_v37  ;;  %1852 = vst [vmem:[%s4733_s1 + $0xbe8] sm:$0x3f] %v1851_v38  ;;  %v1853_v39 = vld [vmem:[%s4732_s0 + $0xbf8] sm:$0x3f] }
  0xf5   :  { %v1855_v40 = vld [vmem:[%s4732_s0 + $0xc08] sm:$0x3f]  ;;  %v1857_v41 = vld [vmem:[%s4732_s0 + $0xc18] sm:$0x3f]  ;;  %1854 = vst [vmem:[%s4733_s1 + $0xbf8] sm:$0x3f] %v1853_v39 }
  0xf6   :  { %1856 = vst [vmem:[%s4733_s1 + $0xc08] sm:$0x3f] %v1855_v40  ;;  %1858 = vst [vmem:[%s4733_s1 + $0xc18] sm:$0x3f] %v1857_v41  ;;  %v1859_v42 = vld [vmem:[%s4732_s0 + $0xc28] sm:$0x3f] }
  0xf7   :  { %v1861_v43 = vld [vmem:[%s4732_s0 + $0xc38] sm:$0x3f]  ;;  %v1863_v44 = vld [vmem:[%s4732_s0 + $0xc48] sm:$0x3f]  ;;  %1860 = vst [vmem:[%s4733_s1 + $0xc28] sm:$0x3f] %v1859_v42 }
  0xf8   :  { %1862 = vst [vmem:[%s4733_s1 + $0xc38] sm:$0x3f] %v1861_v43  ;;  %1864 = vst [vmem:[%s4733_s1 + $0xc48] sm:$0x3f] %v1863_v44  ;;  %v1865_v45 = vld [vmem:[%s4732_s0 + $0xc58] sm:$0x3f] }
  0xf9   :  { %v1867_v46 = vld [vmem:[%s4732_s0 + $0xc68] sm:$0x3f]  ;;  %v1869_v47 = vld [vmem:[%s4732_s0 + $0xc78] sm:$0x3f]  ;;  %1866 = vst [vmem:[%s4733_s1 + $0xc58] sm:$0x3f] %v1865_v45 }
  0xfa   :  { %1868 = vst [vmem:[%s4733_s1 + $0xc68] sm:$0x3f] %v1867_v46  ;;  %1870 = vst [vmem:[%s4733_s1 + $0xc78] sm:$0x3f] %v1869_v47  ;;  %v1871_v48 = vld [vmem:[%s4732_s0 + $0xc88] sm:$0x3f] }
  0xfb   :  { %v1873_v49 = vld [vmem:[%s4732_s0 + $0xc98] sm:$0x3f]  ;;  %v1875_v50 = vld [vmem:[%s4732_s0 + $0xca8] sm:$0x3f]  ;;  %1872 = vst [vmem:[%s4733_s1 + $0xc88] sm:$0x3f] %v1871_v48 }
  0xfc   :  { %1874 = vst [vmem:[%s4733_s1 + $0xc98] sm:$0x3f] %v1873_v49  ;;  %1876 = vst [vmem:[%s4733_s1 + $0xca8] sm:$0x3f] %v1875_v50  ;;  %v1877_v51 = vld [vmem:[%s4732_s0 + $0xcb8] sm:$0x3f] }
  0xfd   :  { %v1879_v52 = vld [vmem:[%s4732_s0 + $0xcc8] sm:$0x3f]  ;;  %v1881_v53 = vld [vmem:[%s4732_s0 + $0xcd8] sm:$0x3f]  ;;  %1878 = vst [vmem:[%s4733_s1 + $0xcb8] sm:$0x3f] %v1877_v51 }
  0xfe   :  { %1880 = vst [vmem:[%s4733_s1 + $0xcc8] sm:$0x3f] %v1879_v52  ;;  %1882 = vst [vmem:[%s4733_s1 + $0xcd8] sm:$0x3f] %v1881_v53  ;;  %v1883_v54 = vld [vmem:[%s4732_s0 + $0xce8] sm:$0x3f] }
  0xff   :  { %v1885_v55 = vld [vmem:[%s4732_s0 + $0xcf8] sm:$0x3f]  ;;  %v1887_v56 = vld [vmem:[%s4732_s0 + $0xd08] sm:$0x3f]  ;;  %1884 = vst [vmem:[%s4733_s1 + $0xce8] sm:$0x3f] %v1883_v54 }
 0x100   :  { %1886 = vst [vmem:[%s4733_s1 + $0xcf8] sm:$0x3f] %v1885_v55  ;;  %1888 = vst [vmem:[%s4733_s1 + $0xd08] sm:$0x3f] %v1887_v56  ;;  %v1889_v57 = vld [vmem:[%s4732_s0 + $0xd18] sm:$0x3f] }
 0x101   :  { %v1891_v58 = vld [vmem:[%s4732_s0 + $0xd28] sm:$0x3f]  ;;  %v1893_v59 = vld [vmem:[%s4732_s0 + $0xd38] sm:$0x3f]  ;;  %1890 = vst [vmem:[%s4733_s1 + $0xd18] sm:$0x3f] %v1889_v57 }
 0x102   :  { %1892 = vst [vmem:[%s4733_s1 + $0xd28] sm:$0x3f] %v1891_v58  ;;  %1894 = vst [vmem:[%s4733_s1 + $0xd38] sm:$0x3f] %v1893_v59  ;;  %v1895_v60 = vld [vmem:[%s4732_s0 + $0xd48] sm:$0x3f] }
 0x103   :  { %v1897_v61 = vld [vmem:[%s4732_s0 + $0xd58] sm:$0x3f]  ;;  %v1899_v62 = vld [vmem:[%s4732_s0 + $0xd68] sm:$0x3f]  ;;  %1896 = vst [vmem:[%s4733_s1 + $0xd48] sm:$0x3f] %v1895_v60 }
 0x104   :  { %1898 = vst [vmem:[%s4733_s1 + $0xd58] sm:$0x3f] %v1897_v61  ;;  %1900 = vst [vmem:[%s4733_s1 + $0xd68] sm:$0x3f] %v1899_v62  ;;  %v1901_v63 = vld [vmem:[%s4732_s0 + $0xd78] sm:$0x3f] }
 0x105   :  { %v1903_v0 = vld [vmem:[%s4732_s0 + $0xd88] sm:$0x3f]  ;;  %v1905_v1 = vld [vmem:[%s4732_s0 + $0xd98] sm:$0x3f]  ;;  %1902 = vst [vmem:[%s4733_s1 + $0xd78] sm:$0x3f] %v1901_v63 }
 0x106   :  { %1904 = vst [vmem:[%s4733_s1 + $0xd88] sm:$0x3f] %v1903_v0  ;;  %1906 = vst [vmem:[%s4733_s1 + $0xd98] sm:$0x3f] %v1905_v1  ;;  %v1907_v2 = vld [vmem:[%s4732_s0 + $0xda8] sm:$0x3f] }
 0x107   :  { %v1909_v3 = vld [vmem:[%s4732_s0 + $0xdb8] sm:$0x3f]  ;;  %v1911_v4 = vld [vmem:[%s4732_s0 + $0xdc8] sm:$0x3f]  ;;  %1908 = vst [vmem:[%s4733_s1 + $0xda8] sm:$0x3f] %v1907_v2 }
 0x108   :  { %1910 = vst [vmem:[%s4733_s1 + $0xdb8] sm:$0x3f] %v1909_v3  ;;  %1912 = vst [vmem:[%s4733_s1 + $0xdc8] sm:$0x3f] %v1911_v4  ;;  %v1913_v5 = vld [vmem:[%s4732_s0 + $0xdd8] sm:$0x3f] }
 0x109   :  { %v1915_v6 = vld [vmem:[%s4732_s0 + $0xde8] sm:$0x3f]  ;;  %v1917_v7 = vld [vmem:[%s4732_s0 + $0xdf8] sm:$0x3f]  ;;  %1914 = vst [vmem:[%s4733_s1 + $0xdd8] sm:$0x3f] %v1913_v5 }
 0x10a   :  { %1916 = vst [vmem:[%s4733_s1 + $0xde8] sm:$0x3f] %v1915_v6  ;;  %1918 = vst [vmem:[%s4733_s1 + $0xdf8] sm:$0x3f] %v1917_v7  ;;  %v1919_v8 = vld [vmem:[%s4732_s0 + $0xe08] sm:$0x3f] }
 0x10b   :  { %v1921_v9 = vld [vmem:[%s4732_s0 + $0xe18] sm:$0x3f]  ;;  %v1923_v10 = vld [vmem:[%s4732_s0 + $0xe28] sm:$0x3f]  ;;  %1920 = vst [vmem:[%s4733_s1 + $0xe08] sm:$0x3f] %v1919_v8 }
 0x10c   :  { %1922 = vst [vmem:[%s4733_s1 + $0xe18] sm:$0x3f] %v1921_v9  ;;  %1924 = vst [vmem:[%s4733_s1 + $0xe28] sm:$0x3f] %v1923_v10  ;;  %v1925_v11 = vld [vmem:[%s4732_s0 + $0xe38] sm:$0x3f] }
 0x10d   :  { %v1927_v12 = vld [vmem:[%s4732_s0 + $0xe48] sm:$0x3f]  ;;  %v1929_v13 = vld [vmem:[%s4732_s0 + $0xe58] sm:$0x3f]  ;;  %1926 = vst [vmem:[%s4733_s1 + $0xe38] sm:$0x3f] %v1925_v11 }
 0x10e   :  { %1928 = vst [vmem:[%s4733_s1 + $0xe48] sm:$0x3f] %v1927_v12  ;;  %1930 = vst [vmem:[%s4733_s1 + $0xe58] sm:$0x3f] %v1929_v13  ;;  %v1931_v14 = vld [vmem:[%s4732_s0 + $0xe68] sm:$0x3f] }
 0x10f   :  { %v1933_v15 = vld [vmem:[%s4732_s0 + $0xe78] sm:$0x3f]  ;;  %1932 = vst [vmem:[%s4733_s1 + $0xe68] sm:$0x3f] %v1931_v14 }
 0x110   :  { %1934 = vst [vmem:[%s4733_s1 + $0xe78] sm:$0x3f] %v1933_v15 }
 0x111   :  { %1445 = vsyncadd [#allocation2], 51968 }
 0x112   :  { %1936 = dma.done.wait [#allocation2], 51968 }
 0x113   :  { %1937 = vsyncadd [#allocation2], 4294915328 }
 0x114   :  { %1451 = vsyncmov [#allocation2] }
 0x117   :  { %s1452_s6 = vpop.sfrf %1451 }
 0x118   :  { %p1935_p0 = scmp.ne.s32.totalorder %s1452_s6, 0 }
 0x11a   :  { %1456 = shalt.err (%p1935_p0)  }

</bundles_post_ra>
